<compile_context>
chip_gen: v7x
topology: tpu7x:2x2x1
jax: 0.10.0
libtpu: 0.0.40
codegen_flags: <defaults>
</compile_context>

<pallas_src>
import functools

import jax
import jax.numpy as jnp
import numpy as np
from jax.experimental import pallas as pl
from jax.experimental.pallas import tpu as pltpu

LANE = 128


def _round_up(n, m):
    return ((n + m - 1) // m) * m


# ----------------------------- Pallas kernel ------------------------------- #
def _relukan_fused_kernel(x_ref, *refs, n_layers):
    """All ReLUKAN layers fused; one batch tile per grid step."""
    out_ref = refs[-1]
    layer_refs = refs[:-1]

    x = x_ref[...]                                           # (TB, In0_pad) f32
    for l in range(n_layers):
        rep_ref, lo_ref, hi_ref, w_ref, b_ref = layer_refs[5 * l: 5 * l + 5]
        # Exact lane replication: x_rep[b, gg*In + in] = x[b, in] (0/1 matrix, MXU).
        x_rep = jnp.dot(x, rep_ref[...], preferred_element_type=jnp.float32)
        # Basis on the flat K axis -- every lane is a real (in, g) pair.
        t = (jnp.maximum(x_rep - lo_ref[...], 0.0) *
             jnp.maximum(hi_ref[...] - x_rep, 0.0))
        basis = (t * t).astype(jnp.bfloat16)                 # r**2 folded into W
        # Single K-fused MXU pass per layer; accumulation stays in the MXU.
        x = jnp.dot(basis, w_ref[...],
                    preferred_element_type=jnp.float32) + b_ref[...]
    out_ref[...] = x.astype(out_ref.dtype)


# ------------------------------- Wrapper ------------------------------------ #
def _pick_tile(batch, tile_b):
    tb = min(tile_b, _round_up(batch, 8))
    if batch > tb:
        return tb                      # multiple grid steps already
    if batch >= 16:
        # Single tile would cover the whole batch: split in two so the "parallel"
        # batch axis has >= 2 steps (both v7x TensorCores get work).
        return _round_up((batch + 1) // 2, 8)
    return tb


def relukan_forward(x, kparams, *, tile_b=512):
    """Full ReLUKAN forward via a single fused pallas_call."""
    B, in0 = x.shape
    in0_pad = kparams[0]["rep"].shape[0]
    out_last = kparams[-1]["out_features"]
    out_last_pad = kparams[-1]["w"].shape[1]

    tb = _pick_tile(B, tile_b)
    b_pad = _round_up(B, tb)

    # Skip the padding round-trip when the input is already aligned.
    if b_pad == B and in0_pad == in0:
        x_in = x.astype(jnp.float32)
    else:
        x_in = jnp.zeros((b_pad, in0_pad), jnp.float32).at[:B, :in0].set(x)

    inputs = [x_in]
    in_specs = [pl.BlockSpec((tb, in0_pad), lambda i: (i, 0))]
    flops = 0
    bytes_accessed = x_in.size * 4 + b_pad * out_last_pad * 4
    for p in kparams:
        in_pad, k_pad = p["rep"].shape
        out_pad = p["w"].shape[1]
        inputs += [p["rep"], p["lo"], p["hi"], p["w"], p["bias"]]
        in_specs += [
            pl.BlockSpec((in_pad, k_pad), lambda i: (0, 0)),
            pl.BlockSpec((1, k_pad), lambda i: (0, 0)),
            pl.BlockSpec((1, k_pad), lambda i: (0, 0)),
            pl.BlockSpec((k_pad, out_pad), lambda i: (0, 0)),
            pl.BlockSpec((1, out_pad), lambda i: (0, 0)),
        ]
        flops += 2 * b_pad * in_pad * k_pad + 2 * b_pad * k_pad * out_pad
        bytes_accessed += (p["rep"].size * 4 + (p["lo"].size + p["hi"].size) * 4
                           + p["w"].size * 2 + p["bias"].size * 4)

    out = pl.pallas_call(
        functools.partial(_relukan_fused_kernel, n_layers=len(kparams)),
        out_shape=jax.ShapeDtypeStruct((b_pad, out_last_pad), jnp.float32),
        grid=(b_pad // tb,),
        in_specs=in_specs,
        out_specs=pl.BlockSpec((tb, out_last_pad), lambda i: (i, 0)),
        compiler_params=pltpu.CompilerParams(
            dimension_semantics=("parallel",),
            vmem_limit_bytes=32 * 1024 * 1024),
        cost_estimate=pl.CostEstimate(
            flops=flops, transcendentals=0, bytes_accessed=bytes_accessed),
    )(*inputs)
    return out[:B, :out_last]


# --------------------------- Parameter construction ------------------------- #
def init_relukan_params(layers_hidden, g, k, key):
    """Deterministic params: kernel flat-K layout (padded, bf16 W, r**2 folded) + f32 reference."""
    num_g = g + k
    r = 4.0 * g * g / ((k + 1) * (k + 1))
    kparams, ref_params = [], []
    in_pad_prev = _round_up(layers_hidden[0], LANE)
    for fin, fout in zip(layers_hidden[:-1], layers_hidden[1:]):
        # phase_low / phase_height exactly as in ReLUKANLayer.__init__
        phase_low_1d = np.arange(-k, g, dtype=np.float32) / g              # (G,)
        phase_high_1d = phase_low_1d + (k + 1) / g
        phase_low = np.tile(phase_low_1d[None, :], (fin, 1))               # (In, G)
        phase_high = np.tile(phase_high_1d[None, :], (fin, 1))

        # Conv2d(1, fout, (g+k, fin)) weight / bias, deterministic init.
        key, kw, kb = jax.random.split(key, 3)
        fan_in = num_g * fin
        bound = 1.0 / np.sqrt(fan_in)
        conv_w = np.asarray(jax.random.uniform(
            kw, (fout, 1, num_g, fin), jnp.float32, minval=-bound, maxval=bound))
        conv_b = np.asarray(jax.random.uniform(
            kb, (fout,), jnp.float32, minval=-bound, maxval=bound))

        # ---- reference layout (exactly the torch full-coverage conv) ----
        # y[b,o] = sum_q basis_flat[b,q] * conv_w[o, 0, q//fin, q%fin] + bias[o]
        w2d = conv_w.reshape(fout, num_g * fin)
        ref_params.append(dict(
            phase_low=jnp.asarray(phase_low),
            phase_high=jnp.asarray(phase_high),
            w2d_t=jnp.asarray(w2d.T),                   # (In*G, Out)
            bias=jnp.asarray(conv_b[None, :]),
            r=float(r),
        ))

        # ---- kernel flat-K layout, flat index p = gg*fin + in ----
        k_flat = num_g * fin
        k_pad = _round_up(k_flat, LANE)
        out_pad = _round_up(fout, LANE)

        # One-hot replication matrix: x_rep[:, gg*fin + in] = x[:, in].
        rep = np.zeros((in_pad_prev, k_pad), np.float32)
        for gg in range(num_g):
            rep[np.arange(fin), gg * fin + np.arange(fin)] = 1.0

        # Phases broadcast over `in`, so flat value only depends on gg = p // fin.
        lo_flat = np.zeros((1, k_pad), np.float32)
        hi_flat = np.zeros((1, k_pad), np.float32)
        lo_flat[0, :k_flat] = np.repeat(phase_low_1d, fin)
        hi_flat[0, :k_flat] = np.repeat(phase_high_1d, fin)
        # Padded K positions: lo=hi=0 -> relu(x)*relu(-x)=0 -> inert.

        # W_flat[gg*fin + in, o] = r^2 * w2d[o, in*G + gg]   (r^2 folded in)
        w_t = w2d.T.reshape(fin, num_g, fout)            # [in, gg, o]
        w3 = np.transpose(w_t, (1, 0, 2)) * (r * r)      # [gg, in, o]
        w_flat = np.zeros((k_pad, out_pad), np.float32)
        w_flat[:k_flat, :fout] = w3.reshape(k_flat, fout)

        bias_pad = np.zeros((1, out_pad), np.float32)
        bias_pad[0, :fout] = conv_b

        kparams.append(dict(
            rep=jnp.asarray(rep),
            lo=jnp.asarray(lo_flat),
            hi=jnp.asarray(hi_flat),
            w=jnp.asarray(w_flat, dtype=jnp.bfloat16),   # MXU-native input dtype
            bias=jnp.asarray(bias_pad),
            out_features=fout,
        ))
        in_pad_prev = out_pad                            # next layer's padded input width
    return kparams, ref_params


# Pure-JAX f32 reference (mirrors the torch forward) for a sanity check.
def _reference_forward(x, ref_params):
    for p in ref_params:
        xe = x[:, :, None]
        b = jnp.maximum(xe - p["phase_low"][None], 0.0) * \
            jnp.maximum(p["phase_high"][None] - xe, 0.0) * p["r"]
        b = b * b
        b = b.reshape(x.shape[0], -1)
        x = b @ p["w2d_t"] + p["bias"]
    return x


if __name__ == "__main__":
    # Small shapes consistent with the module: layers_hidden = [32, 64, 16]
    layers_hidden = [32, 64, 16]
    g, k = 5, 3
    batch = 256                      # -> 2 grid steps of 128 rows (pipeline + megacore)

    key = jax.random.PRNGKey(0)
    key, kx = jax.random.split(key)
    x = jax.random.normal(kx, (batch, layers_hidden[0]), jnp.float32)

    kparams, ref_params = init_relukan_params(layers_hidden, g, k, key)

    out = jax.block_until_ready(relukan_forward(x, kparams))
    ref = jax.block_until_ready(_reference_forward(x, ref_params))

    assert out.shape == (batch, layers_hidden[-1])
    # bf16 MXU weights/basis with f32 accumulation -> deliberately loosened tolerance.
    np.testing.assert_allclose(np.asarray(out), np.asarray(ref),
                               rtol=2e-2, atol=2e-2)
    print("KERNEL_OK")
</pallas_src>

<mosaic_0001>
module attributes {stable_mosaic.version = 11 : i64} {
  func.func @_relukan_fused_kernel(%arg0: i32, %arg1: memref<128x128xf32, #tpu.memory_space<vmem>>, %arg2: memref<128x256xf32, #tpu.memory_space<vmem>>, %arg3: memref<1x256xf32, #tpu.memory_space<vmem>>, %arg4: memref<1x256xf32, #tpu.memory_space<vmem>>, %arg5: memref<256x128xbf16, #tpu.memory_space<vmem>>, %arg6: memref<1x128xf32, #tpu.memory_space<vmem>>, %arg7: memref<128x512xf32, #tpu.memory_space<vmem>>, %arg8: memref<1x512xf32, #tpu.memory_space<vmem>>, %arg9: memref<1x512xf32, #tpu.memory_space<vmem>>, %arg10: memref<512x128xbf16, #tpu.memory_space<vmem>>, %arg11: memref<1x128xf32, #tpu.memory_space<vmem>>, %arg12: memref<128x128xf32, #tpu.memory_space<vmem>>) attributes {dimension_semantics = [#tpu.dimension_semantics<parallel>], iteration_bounds = array<i64: 2>, scalar_prefetch = 0 : i64, scratch_operands = 0 : i64, tpu.core_type = #tpu.core_type<tc>, window_params = [{transform_indices = @transform_0, window_bounds = array<i64: 128, 128>}, {pipeline_mode = #tpu.pipeline_mode<synchronous>, transform_indices = @transform_1, window_bounds = array<i64: 128, 256>}, {pipeline_mode = #tpu.pipeline_mode<synchronous>, transform_indices = @transform_2, window_bounds = array<i64: 1, 256>}, {pipeline_mode = #tpu.pipeline_mode<synchronous>, transform_indices = @transform_3, window_bounds = array<i64: 1, 256>}, {pipeline_mode = #tpu.pipeline_mode<synchronous>, transform_indices = @transform_4, window_bounds = array<i64: 256, 128>}, {pipeline_mode = #tpu.pipeline_mode<synchronous>, transform_indices = @transform_5, window_bounds = array<i64: 1, 128>}, {pipeline_mode = #tpu.pipeline_mode<synchronous>, transform_indices = @transform_6, window_bounds = array<i64: 128, 512>}, {pipeline_mode = #tpu.pipeline_mode<synchronous>, transform_indices = @transform_7, window_bounds = array<i64: 1, 512>}, {pipeline_mode = #tpu.pipeline_mode<synchronous>, transform_indices = @transform_8, window_bounds = array<i64: 1, 512>}, {pipeline_mode = #tpu.pipeline_mode<synchronous>, transform_indices = @transform_9, window_bounds = array<i64: 512, 128>}, {pipeline_mode = #tpu.pipeline_mode<synchronous>, transform_indices = @transform_10, window_bounds = array<i64: 1, 128>}, {transform_indices = @transform_11, window_bounds = array<i64: 128, 128>}]} {
    %c0 = arith.constant 0 : index
    %c0_0 = arith.constant 0 : index
    %0 = vector.load %arg1[%c0, %c0_0] : memref<128x128xf32, #tpu.memory_space<vmem>>, vector<128x128xf32>
    %c0_1 = arith.constant 0 : index
    %c0_2 = arith.constant 0 : index
    %1 = vector.load %arg2[%c0_1, %c0_2] : memref<128x256xf32, #tpu.memory_space<vmem>>, vector<128x256xf32>
    %cst = arith.constant dense<0.000000e+00> : vector<128x256xf32>
    %2 = tpu.matmul %0, %1, %cst {dimension_numbers = #tpu.dot_dimension_numbers<[1], [0], [0], [1], [0, 0, 1, 1], [], []>} : vector<128x128xf32>, vector<128x256xf32>, vector<128x256xf32> -> vector<128x256xf32>
    %c0_3 = arith.constant 0 : index
    %c0_4 = arith.constant 0 : index
    %3 = vector.load %arg3[%c0_3, %c0_4] : memref<1x256xf32, #tpu.memory_space<vmem>>, vector<1x256xf32>
    %4 = vector.broadcast %3 : vector<1x256xf32> to vector<128x256xf32>
    %5 = arith.subf %2, %4 : vector<128x256xf32>
    %cst_5 = arith.constant 0.000000e+00 : f32
    %6 = vector.broadcast %cst_5 : f32 to vector<128x256xf32>
    %7 = arith.maximumf %5, %6 : vector<128x256xf32>
    %c0_6 = arith.constant 0 : index
    %c0_7 = arith.constant 0 : index
    %8 = vector.load %arg4[%c0_6, %c0_7] : memref<1x256xf32, #tpu.memory_space<vmem>>, vector<1x256xf32>
    %9 = vector.broadcast %8 : vector<1x256xf32> to vector<128x256xf32>
    %10 = arith.subf %9, %2 : vector<128x256xf32>
    %cst_8 = arith.constant 0.000000e+00 : f32
    %11 = vector.broadcast %cst_8 : f32 to vector<128x256xf32>
    %12 = arith.maximumf %10, %11 : vector<128x256xf32>
    %13 = arith.mulf %7, %12 : vector<128x256xf32>
    %14 = arith.mulf %13, %13 : vector<128x256xf32>
    %15 = arith.truncf %14 : vector<128x256xf32> to vector<128x256xbf16>
    %c0_9 = arith.constant 0 : index
    %c0_10 = arith.constant 0 : index
    %16 = vector.load %arg5[%c0_9, %c0_10] : memref<256x128xbf16, #tpu.memory_space<vmem>>, vector<256x128xbf16>
    %cst_11 = arith.constant dense<0.000000e+00> : vector<128x128xf32>
    %17 = tpu.matmul %15, %16, %cst_11 {dimension_numbers = #tpu.dot_dimension_numbers<[1], [0], [0], [1], [0, 0, 1, 1], [], []>} : vector<128x256xbf16>, vector<256x128xbf16>, vector<128x128xf32> -> vector<128x128xf32>
    %c0_12 = arith.constant 0 : index
    %c0_13 = arith.constant 0 : index
    %18 = vector.load %arg6[%c0_12, %c0_13] : memref<1x128xf32, #tpu.memory_space<vmem>>, vector<1x128xf32>
    %19 = vector.broadcast %18 : vector<1x128xf32> to vector<128x128xf32>
    %20 = arith.addf %17, %19 : vector<128x128xf32>
    %c0_14 = arith.constant 0 : index
    %c0_15 = arith.constant 0 : index
    %21 = vector.load %arg7[%c0_14, %c0_15] : memref<128x512xf32, #tpu.memory_space<vmem>>, vector<128x512xf32>
    %cst_16 = arith.constant dense<0.000000e+00> : vector<128x512xf32>
    %22 = tpu.matmul %20, %21, %cst_16 {dimension_numbers = #tpu.dot_dimension_numbers<[1], [0], [0], [1], [0, 0, 1, 1], [], []>} : vector<128x128xf32>, vector<128x512xf32>, vector<128x512xf32> -> vector<128x512xf32>
    %c0_17 = arith.constant 0 : index
    %c0_18 = arith.constant 0 : index
    %23 = vector.load %arg8[%c0_17, %c0_18] : memref<1x512xf32, #tpu.memory_space<vmem>>, vector<1x512xf32>
    %24 = vector.broadcast %23 : vector<1x512xf32> to vector<128x512xf32>
    %25 = arith.subf %22, %24 : vector<128x512xf32>
    %cst_19 = arith.constant 0.000000e+00 : f32
    %26 = vector.broadcast %cst_19 : f32 to vector<128x512xf32>
    %27 = arith.maximumf %25, %26 : vector<128x512xf32>
    %c0_20 = arith.constant 0 : index
    %c0_21 = arith.constant 0 : index
    %28 = vector.load %arg9[%c0_20, %c0_21] : memref<1x512xf32, #tpu.memory_space<vmem>>, vector<1x512xf32>
    %29 = vector.broadcast %28 : vector<1x512xf32> to vector<128x512xf32>
    %30 = arith.subf %29, %22 : vector<128x512xf32>
    %cst_22 = arith.constant 0.000000e+00 : f32
    %31 = vector.broadcast %cst_22 : f32 to vector<128x512xf32>
    %32 = arith.maximumf %30, %31 : vector<128x512xf32>
    %33 = arith.mulf %27, %32 : vector<128x512xf32>
    %34 = arith.mulf %33, %33 : vector<128x512xf32>
    %35 = arith.truncf %34 : vector<128x512xf32> to vector<128x512xbf16>
    %c0_23 = arith.constant 0 : index
    %c0_24 = arith.constant 0 : index
    %36 = vector.load %arg10[%c0_23, %c0_24] : memref<512x128xbf16, #tpu.memory_space<vmem>>, vector<512x128xbf16>
    %cst_25 = arith.constant dense<0.000000e+00> : vector<128x128xf32>
    %37 = tpu.matmul %35, %36, %cst_25 {dimension_numbers = #tpu.dot_dimension_numbers<[1], [0], [0], [1], [0, 0, 1, 1], [], []>} : vector<128x512xbf16>, vector<512x128xbf16>, vector<128x128xf32> -> vector<128x128xf32>
    %c0_26 = arith.constant 0 : index
    %c0_27 = arith.constant 0 : index
    %38 = vector.load %arg11[%c0_26, %c0_27] : memref<1x128xf32, #tpu.memory_space<vmem>>, vector<1x128xf32>
    %39 = vector.broadcast %38 : vector<1x128xf32> to vector<128x128xf32>
    %40 = arith.addf %37, %39 : vector<128x128xf32>
    %c0_28 = arith.constant 0 : index
    %c0_29 = arith.constant 0 : index
    %41 = vector.load %arg12[%c0_28, %c0_29] : memref<128x128xf32, #tpu.memory_space<vmem>>, vector<128x128xf32>
    tpu.vector_store %arg12[%c0_28, %c0_29], %40 {strides = array<i32>} : memref<128x128xf32, #tpu.memory_space<vmem>>, vector<128x128xf32>,
    return
  }
  func.func @transform_0(%arg0: i32) -> (i32, i32) {
    %c0_i32 = arith.constant 0 : i32
    %c0_i32_0 = arith.constant 0 : i32
    return %arg0, %c0_i32 : i32, i32
  }
  func.func @transform_1(%arg0: i32) -> (i32, i32) {
    %c0_i32 = arith.constant 0 : i32
    %c0_i32_0 = arith.constant 0 : i32
    %c0_i32_1 = arith.constant 0 : i32
    return %c0_i32, %c0_i32_0 : i32, i32
  }
  func.func @transform_2(%arg0: i32) -> (i32, i32) {
    %c0_i32 = arith.constant 0 : i32
    %c0_i32_0 = arith.constant 0 : i32
    %c0_i32_1 = arith.constant 0 : i32
    return %c0_i32, %c0_i32_0 : i32, i32
  }
  func.func @transform_3(%arg0: i32) -> (i32, i32) {
    %c0_i32 = arith.constant 0 : i32
    %c0_i32_0 = arith.constant 0 : i32
    %c0_i32_1 = arith.constant 0 : i32
    return %c0_i32, %c0_i32_0 : i32, i32
  }
  func.func @transform_4(%arg0: i32) -> (i32, i32) {
    %c0_i32 = arith.constant 0 : i32
    %c0_i32_0 = arith.constant 0 : i32
    %c0_i32_1 = arith.constant 0 : i32
    return %c0_i32, %c0_i32_0 : i32, i32
  }
  func.func @transform_5(%arg0: i32) -> (i32, i32) {
    %c0_i32 = arith.constant 0 : i32
    %c0_i32_0 = arith.constant 0 : i32
    %c0_i32_1 = arith.constant 0 : i32
    return %c0_i32, %c0_i32_0 : i32, i32
  }
  func.func @transform_6(%arg0: i32) -> (i32, i32) {
    %c0_i32 = arith.constant 0 : i32
    %c0_i32_0 = arith.constant 0 : i32
    %c0_i32_1 = arith.constant 0 : i32
    return %c0_i32, %c0_i32_0 : i32, i32
  }
  func.func @transform_7(%arg0: i32) -> (i32, i32) {
    %c0_i32 = arith.constant 0 : i32
    %c0_i32_0 = arith.constant 0 : i32
    %c0_i32_1 = arith.constant 0 : i32
    return %c0_i32, %c0_i32_0 : i32, i32
  }
  func.func @transform_8(%arg0: i32) -> (i32, i32) {
    %c0_i32 = arith.constant 0 : i32
    %c0_i32_0 = arith.constant 0 : i32
    %c0_i32_1 = arith.constant 0 : i32
    return %c0_i32, %c0_i32_0 : i32, i32
  }
  func.func @transform_9(%arg0: i32) -> (i32, i32) {
    %c0_i32 = arith.constant 0 : i32
    %c0_i32_0 = arith.constant 0 : i32
    %c0_i32_1 = arith.constant 0 : i32
    return %c0_i32, %c0_i32_0 : i32, i32
  }
  func.func @transform_10(%arg0: i32) -> (i32, i32) {
    %c0_i32 = arith.constant 0 : i32
    %c0_i32_0 = arith.constant 0 : i32
    %c0_i32_1 = arith.constant 0 : i32
    return %c0_i32, %c0_i32_0 : i32, i32
  }
  func.func @transform_11(%arg0: i32) -> (i32, i32) {
    %c0_i32 = arith.constant 0 : i32
    %c0_i32_0 = arith.constant 0 : i32
    return %arg0, %c0_i32 : i32, i32
  }
}

</mosaic_0001>

<bundles_post_ra>
// kernel: tpu_custom_call.1
= control target key start
LH: loop header
LB: loop body
LE: loop exit
PB: predicated region body
PF: predicated region fallthrough
CT: control target
= control target key end

     0   :  { %s4434_s0 = inlined_call_operand.hbm [shape: f32[256,128], index: 0, kind: input, shape index: {}]   ;;  %s4435_s1 = inlined_call_operand.hbm [shape: f32[128,256], index: 1, kind: input, shape index: {}]   ;;  %s4436_s2 = inlined_call_operand.vmem [shape: f32[1,256], index: 2, kind: input, shape index: {}]   ;;  %s4437_s3 = inlined_call_operand.hbm [shape: f32[1,256], index: 3, kind: input, shape index: {}]   ;;  %s4438_s4 = inlined_call_operand.hbm [shape: bf16[256,128], index: 4, kind: input, shape index: {}]   ;;  %s4439_s5 = inlined_call_operand.vmem [shape: f32[1,128], index: 5, kind: input, shape index: {}]   ;;  %s4440_s6 = inlined_call_operand.hbm [shape: f32[128,512], index: 6, kind: input, shape index: {}]   ;;  %s4441_s7 = inlined_call_operand.vmem [shape: f32[1,512], index: 7, kind: input, shape index: {}]   ;;  %s4442_s8 = inlined_call_operand.vmem [shape: f32[1,512], index: 8, kind: input, shape index: {}]   ;;  %s4443_s9 = inlined_call_operand.hbm [shape: bf16[512,128], index: 9, kind: input, shape index: {}]   ;;  %s4444_s10 = inlined_call_operand.vmem [shape: f32[1,128], index: 10, kind: input, shape index: {}]   ;;  %s4445_s11 = inlined_call_operand.hbm [shape: f32[256,128], index: 11, kind: output, shape index: {}]  }
   0x1   :  { %4454 = sst [smem:[#allocation21_spill]] %s4442_s8 }
   0x2   :  { %4455 = sst [smem:[#allocation22_spill]] %s4444_s10 }
   0x3   :  { %4456 = sst [smem:[#allocation23_spill]] %s4445_s11 }
   0x4   :  { %16 = vsyncpa [#allocation3], 0 }
   0x5   :  { %18 = vsyncpa [#allocation3 + $0x1], 0 }
   0x6   :  { %19 = vsyncpa [#allocation6], 0 }
   0x7   :  { %20 = vsyncpa [#allocation9], 0 }
   0x8   :  { %21 = vsyncpa [#allocation12], 0 }
   0x9   :  { %22 = vsyncpa [#allocation4], 0 }
   0xa   :  { %24 = vsyncpa [#allocation4 + $0x1], 0  ;;  %s3454_s17 = smov 0   ;;  %s3456_s18 = smov 0  }
   0xb   :  { %s3458_s19 = smov 0   ;;  %s3460_s20 = smov 0  }
   0xc LB: > { %s3376_s21 = smov [#allocation5]   ;;  %s3475_s23 = sadd.s32 4294967295, %s3374_s20   ;;  %s3374_s20 = sphi %s3460_s20, %s4487_s20   ;;  %s3370_s19 = sphi %s3458_s19, %s4486_s19   ;;  %s3366_s18 = sphi %s3456_s18, %s4485_s18   ;;  %s3362_s17 = sphi %s3454_s17, %s4484_s17  }
   0xd   : > { %s309_s22 = sshll.u32 %s3376_s21, 4  ;;  %p2607_p0 = scmp.ge.s32.totalorder %s3374_s20, 1  ;;  %s3480_s22 = int_to_ptr.vmem [resolvable:$true] %s309_s22 }
   0xe   : > { %p4447_p1 = scmp.eq.s32.totalorder %s3475_s23, 0  ;;  %p297_p2 = scmp.lt.s32.totalorder %s3374_s20, 3 }
   0xf   : > { %s3377_s25 = smov [#allocation8]   ;;  %s3378_s28 = smov [#allocation7]  }
  0x10   : > { %p3482_p3 = pnand %p2607_p0, %p297_p2  ;;  %s336_s26 = sshll.u32 %s3377_s25, 4  ;;  %s3495_s26 = int_to_ptr.vmem [resolvable:$true] %s336_s26 }
  0x11   : > { %s3497_s29 = sshll.u32 %s3378_s28, 4  ;;  %s3126_s13 = scalar_lea.hbm %s4435_s1, 4096  ;;  %s327_s29 = int_to_ptr.vmem [resolvable:$true] %s3497_s29 }
  0x12   : > { %s4457_s24 = scalar_select %p3482_p3, 1, 0 }
  0x13   : > { %p2994_p5 = pneg %p3482_p3  ;;  %p3127_p7 = scmp.ne.s32.totalorder %s4435_s1, %s3126_s13 }
  0x14   : > { %p3133_p11 = scmp.lt.u32.totalorder %s3126_s13, %s4435_s1 }
  0x15   : > { %p3491_p6 = pnand %p2994_p5, %p4447_p1 }
  0x17   : > { %p3507_p8 = pneg %p3491_p6 }
  0x19   : > { %p3129_p9 = pnand %p3507_p8, %p3127_p7 }
  0x1b   : > { %p3130_p10 = pneg %p3129_p9 }
  0x1d   : > { %p3135_p12 = pnand %p3133_p11, %p3130_p10 }
  0x1f   : > { %3138 = shalt.err (!%p3135_p12)
}
  0x20   : > { %s3139_s28 = scalar_lea.vmem %s3480_s22, 4096  ;;  %p3147_p5 = scmp.lt.s32.totalorder %s3480_s22, %s3480_s22 }
  0x21   : > { %p3140_p13 = scmp.ne.s32.totalorder %s3480_s22, %s3139_s28  ;;  %p3148_p4 = scmp.lt.s32.totalorder %s3139_s28, %s3139_s28 }
  0x23   : > { %p3142_p0 = pnand %p3140_p13, %p3507_p8  ;;  %p3149_p7 = por %p3148_p4, %p3147_p5 }
  0x25   : > { %p3143_p2 = pneg %p3142_p0 }
  0x27   : > { %p3150_p9 = pnand %p3149_p7, %p3143_p2 }
  0x29   : > { %3153 = shalt.err (!%p3150_p9)
}
  0x2a   : > { %s3379_s30 = smov 256   ;;  %s3380_s12 = smov 16  }
  0x2b   : > { %2997 = dma.hbm_to_vmem [thread:$0]  (!%p3491_p6), %s4435_s1, 4096, %s3480_s22, [#allocation6], %s3379_s30, %s3379_s30, %s3380_s12  }
  0x2c   : > { %s3154_s25 = scalar_lea.hbm %s4438_s4, 2048 }
  0x2d   : > { %p3155_p4 = scmp.ne.s32.totalorder %s4438_s4, %s3154_s25  ;;  %p3161_p12 = scmp.lt.u32.totalorder %s3154_s25, %s4438_s4 }
  0x2f   : > { %p3157_p10 = pnand %p3155_p4, %p3507_p8 }
  0x31   : > { %p3158_p11 = pneg %p3157_p10 }
  0x33   : > { %p3163_p13 = pnand %p3161_p12, %p3158_p11 }
  0x35   : > { %3166 = shalt.err (!%p3163_p13)
}
  0x36   : > { %s3167_s22 = scalar_lea.vmem %s3495_s26, 2048  ;;  %p3175_p7 = scmp.lt.s32.totalorder %s3495_s26, %s3495_s26 }
  0x37   : > { %p3168_p0 = scmp.ne.s32.totalorder %s3495_s26, %s3167_s22  ;;  %p3176_p9 = scmp.lt.s32.totalorder %s3167_s22, %s3167_s22 }
  0x39   : > { %p3170_p2 = pnand %p3168_p0, %p3507_p8  ;;  %p3177_p4 = por %p3176_p9, %p3175_p7 }
  0x3b   : > { %p3171_p5 = pneg %p3170_p2 }
  0x3d   : > { %p3178_p10 = pnand %p3177_p4, %p3171_p5 }
  0x3f   : > { %3181 = shalt.err (!%p3178_p10)
}
  0x40   : > { %s4449_s10 = smov 64   ;;  %s4450_s8 = smov 4  }
  0x41   : > { %3003 = dma.hbm_to_vmem [thread:$0]  (!%p3491_p6), %s4438_s4, 2048, %s3495_s26, [#allocation9], %s4449_s10, %s4449_s10, %s4450_s8  }
  0x42   : > { %s3182_s14 = scalar_lea.hbm %s4437_s3, 32 }
  0x43   : > { %p3183_p11 = scmp.ne.s32.totalorder %s4437_s3, %s3182_s14  ;;  %p3189_p0 = scmp.lt.u32.totalorder %s3182_s14, %s4437_s3 }
  0x45   : > { %p3185_p12 = pnand %p3183_p11, %p3507_p8 }
  0x47   : > { %p3186_p13 = pneg %p3185_p12 }
  0x49   : > { %p3191_p2 = pnand %p3189_p0, %p3186_p13 }
  0x4b   : > { %3194 = shalt.err (!%p3191_p2)
}
  0x4c   : > { %s3195_s22 = scalar_lea.vmem %s327_s29, 32  ;;  %p3203_p4 = scmp.lt.s32.totalorder %s327_s29, %s327_s29 }
  0x4d   : > { %p3196_p5 = scmp.ne.s32.totalorder %s327_s29, %s3195_s22  ;;  %p3204_p10 = scmp.lt.s32.totalorder %s3195_s22, %s3195_s22 }
  0x4f   : > { %p3198_p7 = pnand %p3196_p5, %p3507_p8  ;;  %p3205_p1 = por %p3204_p10, %p3203_p4 }
  0x51   : > { %p3199_p9 = pneg %p3198_p7 }
  0x53   : > { %p3206_p3 = pnand %p3205_p1, %p3199_p9 }
  0x55   : > { %3209 = shalt.err (!%p3206_p3)
}
  0x56   : > { %3000 = dma.hbm_to_vmem [thread:$0]  (!%p3491_p6), %s4437_s3, 32, %s327_s29, [#allocation6]  }
  0x57   : > { %s3383_s30 = smov [#allocation10]   ;;  %s3210_s15 = scalar_lea.hbm %s4440_s6, 8192 }
  0x58   : > { %s352_s12 = sshll.u32 %s3383_s30, 4  ;;  %p3211_p11 = scmp.ne.s32.totalorder %s4440_s6, %s3210_s15  ;;  %s353_s12 = int_to_ptr.vmem [resolvable:$true] %s352_s12 }
  0x59   : > { %p3217_p12 = scmp.lt.u32.totalorder %s3210_s15, %s4440_s6 }
  0x5a   : > { %p3213_p1 = pnand %p3211_p11, %p3507_p8 }
  0x5c   : > { %p3214_p3 = pneg %p3213_p1 }
  0x5e   : > { %p3219_p13 = pnand %p3217_p12, %p3214_p3 }
  0x60   : > { %3222 = shalt.err (!%p3219_p13)
}
  0x61   : > { %s3223_s29 = scalar_lea.vmem %s353_s12, 8192  ;;  %p3231_p7 = scmp.lt.s32.totalorder %s353_s12, %s353_s12 }
  0x62   : > { %p3224_p0 = scmp.ne.s32.totalorder %s353_s12, %s3223_s29  ;;  %p3232_p9 = scmp.lt.s32.totalorder %s3223_s29, %s3223_s29 }
  0x64   : > { %p3226_p2 = pnand %p3224_p0, %p3507_p8  ;;  %p3233_p4 = por %p3232_p9, %p3231_p7 }
  0x66   : > { %p3227_p5 = pneg %p3226_p2 }
  0x68   : > { %p3234_p10 = pnand %p3233_p4, %p3227_p5 }
  0x6a   : > { %3237 = shalt.err (!%p3234_p10)
}
  0x6b   : > { %s3384_s26 = smov 512   ;;  %s3385_s11 = smov 32  }
  0x6c   : > { %3006 = dma.hbm_to_vmem [thread:$0]  (!%p3491_p6), %s4440_s6, 8192, %s353_s12, [#allocation9], %s3384_s26, %s3384_s26, %s3385_s11  }
  0x6d   : > { %s3386_s14 = smov [#allocation11]   ;;  %s3238_s28 = scalar_lea.hbm %s4443_s9, 4096 }
  0x6e   : > { %s371_s15 = sshll.u32 %s3386_s14, 4  ;;  %p3239_p11 = scmp.ne.s32.totalorder %s4443_s9, %s3238_s28  ;;  %s372_s15 = int_to_ptr.vmem [resolvable:$true] %s371_s15 }
  0x6f   : > { %p3245_p12 = scmp.lt.u32.totalorder %s3238_s28, %s4443_s9 }
  0x70   : > { %p3241_p1 = pnand %p3239_p11, %p3507_p8 }
  0x72   : > { %p3242_p3 = pneg %p3241_p1 }
  0x74   : > { %p3247_p13 = pnand %p3245_p12, %p3242_p3 }
  0x76   : > { %3250 = shalt.err (!%p3247_p13)
}
  0x77   : > { %s3251_s12 = scalar_lea.vmem %s372_s15, 4096  ;;  %p3259_p7 = scmp.lt.s32.totalorder %s372_s15, %s372_s15 }
  0x78   : > { %p3252_p0 = scmp.ne.s32.totalorder %s372_s15, %s3251_s12  ;;  %p3260_p9 = scmp.lt.s32.totalorder %s3251_s12, %s3251_s12 }
  0x7a   : > { %p3254_p2 = pnand %p3252_p0, %p3507_p8  ;;  %p3261_p4 = por %p3260_p9, %p3259_p7 }
  0x7c   : > { %p3255_p5 = pneg %p3254_p2 }
  0x7e   : > { %p3262_p10 = pnand %p3261_p4, %p3255_p5 }
  0x80   : > { %3265 = shalt.err (!%p3262_p10)
}
  0x81   : > { %s4460_s26 = smov 4   ;;  %s4461_s11 = smov 64  }
  0x82   : > { %3009 = dma.hbm_to_vmem [thread:$0]  (!%p3491_p6), %s4443_s9, 4096, %s372_s15, [#allocation12], %s4461_s11, %s4461_s11, %s4460_s26  }
  0x83   : > { %s2606_s27 = sadd.s32 4294967294, %s3374_s20   ;;  %s3614_s16 = sadd.s32 1, %s3374_s20  }
  0x84   : > { %s37_s30 = sadd.s32 1, %s3370_s19  ;;  %s34_s13 = ssub.s32 %s3374_s20, %s3614_s16 }
  0x85   : > { %p44_p8 = scmp.ne.s32.totalorder %s3370_s19, %s3366_s18  ;;  %p35_p11 = scmp.eq.s32.totalorder %s34_s13, 0 }
  0x86   : > { %p45_p1 = scmp.eq.s32.totalorder %s3374_s20, 0  ;;  %p50_p3 = scmp.ne.s32.totalorder %s3366_s18, %s3362_s17 }
  0x87   : > { %p284_p12 = scmp.eq.s32.totalorder %s3475_s23, 1  ;;  %p4462_p0 = scmp.eq.s32.totalorder %s3475_s23, 0 }
  0x88   : > { %s3626_s14 = scalar_select %p35_p11, %s3370_s19, %s37_s30  }
  0x89   : > { %p46_p13 = por %p45_p1, %p44_p8  ;;  %p3630_p2 = por %p4462_p0, %p50_p3 }
  0x8a   : > { %p3634_p6 = por %p284_p12, %p44_p8  ;;  %p290_p5 = scmp.eq.s32.totalorder %s2606_s27, 1 }
  0x8b   : > { %p3023_p7 = scmp.lt.s32.totalorder %s3374_s20, 2  ;;  %s388_s25 = sand.u32 1, %s3370_s19  }
  0x8c   : > { %s4464_s15 = scalar_select %p3634_p6, 1, 0 }
  0x8d   : > { %p3640_p9 = por %p290_p5, %p50_p3  ;;  %s2614_s22 = sshll.u32 %s388_s25, 7 }
  0x8e   : > { %s2680_s29 = sshll.u32 %s3374_s20, 11  ;;  %s392_s10 = scalar_lea.vmem [#allocation2], %s2614_s22 }
  0x8f   : > { %s4465_s28 = scalar_select %p3640_p9, 1, 0 }
  0x90   : > { %s3648_s11 = scalar_lea.hbm %s4434_s0, %s2680_s29  ;;  %s399_s8 = sshll.u32 %s392_s10, 4  ;;  %s3654_s8 = int_to_ptr.vmem [resolvable:$true] %s399_s8 }
  0x91   : > { %p3650_p4 = pnand %p3023_p7, %p46_p13  ;;  %s3656_s30 = scalar_lea.sflag [#allocation3], %s388_s25 }
  0x92   : > { %s3266_s13 = scalar_lea.hbm %s3648_s11, 2048  ;;  %s3271_s12 = scalar_lea.hbm %s4434_s0, 4096 }
  0x93   : > { %p3267_p10 = scmp.ne.s32.totalorder %s3648_s11, %s3266_s13  ;;  %p3268_p8 = pneg %p3650_p4 }
  0x94   : > { %p3272_p3 = scmp.lt.u32.totalorder %s3648_s11, %s4434_s0  ;;  %p3273_p12 = scmp.lt.u32.totalorder %s3271_s12, %s3266_s13 }
  0x95   : > { %p3269_p11 = pnand %p3268_p8, %p3267_p10  ;;  %p3275_p0 = scmp.lt.u32.totalorder %s3266_s13, %s3648_s11 }
  0x96   : > { %p3274_p13 = por %p3273_p12, %p3272_p3 }
  0x97   : > { %p3270_p1 = pneg %p3269_p11 }
  0x98   : > { %p3276_p5 = por %p3275_p0, %p3274_p13 }
  0x9a   : > { %p3277_p7 = pnand %p3276_p5, %p3270_p1 }
  0x9c   : > { %3280 = shalt.err (!%p3277_p7)
}
  0x9d   : > { %s3281_s25 = scalar_lea.vmem %s3654_s8, 2048  ;;  %s3387_s22 = smov [#allocation2]  }
  0x9e   : > { %p3282_p10 = scmp.ne.s32.totalorder %s3654_s8, %s3281_s25  ;;  %s3286_s29 = sshll.u32 %s3387_s22, 4  ;;  %s3287_s29 = int_to_ptr.vmem [resolvable:$false] %s3286_s29 }
  0x9f   : > { %s3288_s26 = scalar_lea.vmem %s3287_s29, 4096  ;;  %p3289_p6 = scmp.lt.s32.totalorder %s3654_s8, %s3287_s29 }
  0xa0   : > { %p3284_p11 = pnand %p3282_p10, %p3268_p8  ;;  %p3290_p3 = scmp.lt.s32.totalorder %s3288_s26, %s3281_s25 }
  0xa2   : > { %p3285_p9 = pneg %p3284_p11  ;;  %p3291_p12 = por %p3290_p3, %p3289_p6 }
  0xa4   : > { %p3292_p13 = pnand %p3291_p12, %p3285_p9 }
  0xa6   : > { %3295 = shalt.err (!%p3292_p13)
}
  0xa7   : > { %s3388_s13 = smov 128   ;;  %s3389_s12 = smov 8  }
  0xa8   : > { %3013 = dma.hbm_to_vmem [thread:$0]  (!%p3650_p4), %s3648_s11, 2048, %s3654_s8, %s3656_s30, %s3388_s13, %s3388_s13, %s3389_s12  }
  0xa9   : > { %p4467_p8 = scmp.ne.s32.totalorder %s4457_s24, 0 }
  0xab   : > { %411 = sbr.rel (%p4467_p8) target bundleno = 1230 (0x4ce), region = 64 }
  0xb2   : > { %s3687_s10 = sand.u32 1, %s3366_s18  }
  0xb3   : > { %s2618_s25 = sshll.u32 %s3687_s10, 7  ;;  %s414_s22 = scalar_lea.sflag [#allocation3], %s3687_s10 }
  0xb4   : > { %s3693_s29 = scalar_lea.vmem [#allocation2], %s2618_s25 }
  0xb5   : > { %3341 = dma.done.wait (%p3630_p2), %s414_s22, 2048  }
  0xb6   : > { %3343 = vsyncadd (%p3630_p2), %s414_s22, 4294965248  ;;  %p4468_p6 = scmp.eq.s32.totalorder %s3475_s23, 0 }
  0xb8   : > { %3345 = dma.done.wait (%p4468_p6), [#allocation6], 4128   ;;  %p4469_p9 = pmov %p4468_p6 }
  0xb9   : > { %p4470_p4 = pmov %p4468_p6 }
  0xba   : > { %3347 = vsyncadd (%p4469_p9), [#allocation6], 4294963168 }
  0xbb   : > { %3349 = dma.done.wait (%p4470_p4), [#allocation9], 10240   ;;  %p4471_p1 = pmov %p4470_p4 }
  0xbd   : > { %3351 = vsyncadd (%p4471_p1), [#allocation9], 4294957056  ;;  %p4472_p0 = pmov %p4471_p1 }
  0xbf   : > { %3353 = dma.done.wait (%p4472_p0), [#allocation12], 4096   ;;  %p4473_p5 = pmov %p4472_p0 }
  0xc0   : > { %v3390_v0 = vmov 0.0   ;;  %v496_v1 = vld [vmem:[#allocation5 + $0x8] sm:$0xff]  ;;  %v498_v2 = vld [vmem:[#allocation5 + $0x18] sm:$0xff]  ;;  %v495_v3 = vld [vmem:[#allocation5] sm:$0xff]  ;;  %s4474_s12 = sld [smem:[#allocation21_spill]]  ;;  %s4479_s24 = sld [smem:[#allocation22_spill]] }
  0xc1   : > { %3355 = vsyncadd (%p4473_p5), [#allocation12], 4294963200  ;;  %591 = vmatprep.mubr.f32.mxu0 %v3390_v0  ;;  %v2874_v4 = vpack.c.bf16 %v498_v2, %v496_v1  ;;  %v497_v5 = vld [vmem:[#allocation5 + $0x10] sm:$0xff]  ;;  %v500_v6 = vld [vmem:[#allocation5 + $0x28] sm:$0xff]  ;;  %s4351_s21 = scalar_lea.vmem [#allocation13], %s2618_s25  ;;  %s2681_s25 = sshll.u32 %s3475_s23, 11 }
  0xc2   : > { %v502_v7 = vld [vmem:[#allocation5 + $0x38] sm:$0xff]  ;;  %v2876_v8 = vpack.c.bf16 %v497_v5, %v495_v3  ;;  %v499_v10 = vld [vmem:[#allocation5 + $0x20] sm:$0xff]  ;;  %v501_v11 = vld [vmem:[#allocation5 + $0x30] sm:$0xff]  ;;  %s2485_s11 = sshll.u32 %s4351_s21, 4  ;;  %s4480_s30 = sld [smem:[#allocation23_spill]]  ;;  %s4388_s11 = int_to_ptr.vmem [resolvable:$true] %s2485_s11 }
  0xc3   : > { %v2878_v9 = vpack.c.bf16 %v502_v7, %v500_v6  ;;  %v504_v12 = vld [vmem:[#allocation5 + $0x48] sm:$0xff]  ;;  %2875 = vmatprep.subr.bf16.mxu0 %v2874_v4  ;;  %v506_v13 = vld [vmem:[#allocation5 + $0x58] sm:$0xff]  ;;  %v2880_v14 = vpack.c.bf16 %v501_v11, %v499_v10  ;;  %v503_v16 = vld [vmem:[#allocation5 + $0x40] sm:$0xff]  ;;  %s2472_s13 = scalar_lea.sflag [#allocation4], %s3687_s10  ;;  %s3296_s23 = scalar_lea.vmem %s4388_s11, 2048 }
  0xc4   : > { %2877 = vmatpush1.bf16.msra.mxu0 %v2876_v8  ;;  %v2882_v15 = vpack.c.bf16 %v506_v13, %v504_v12  ;;  %v505_v17 = vld [vmem:[#allocation5 + $0x50] sm:$0xff]  ;;  %v508_v18 = vld [vmem:[#allocation5 + $0x68] sm:$0xff]  ;;  %v510_v19 = vld [vmem:[#allocation5 + $0x78] sm:$0xff]  ;;  %p3297_p2 = scmp.ne.s32.totalorder %s4388_s11, %s3296_s23  ;;  %p4481_p7 = scmp.ne.s32.totalorder %s4464_s15, 0 }
  0xc5   : > { %2879 = vmatprep.subr.bf16.mxu0 %v2878_v9  ;;  %v2884_v20 = vpack.c.bf16 %v505_v17, %v503_v16  ;;  %v2886_v21 = vpack.c.bf16 %v510_v19, %v508_v18  ;;  %v507_v22 = vld [vmem:[#allocation5 + $0x60] sm:$0xff]  ;;  %v509_v23 = vld [vmem:[#allocation5 + $0x70] sm:$0xff]  ;;  %v512_v24 = vld [vmem:[#allocation5 + $0x88] sm:$0xff] }
  0xc6   : > { %v514_v25 = vld [vmem:[#allocation5 + $0x98] sm:$0xff]  ;;  %v2888_v26 = vpack.c.bf16 %v509_v23, %v507_v22  ;;  %v511_v28 = vld [vmem:[#allocation5 + $0x80] sm:$0xff]  ;;  %v513_v29 = vld [vmem:[#allocation5 + $0x90] sm:$0xff]  ;;  %p3298_p10 = pnand %p3297_p2, %p4481_p7 }
  0xc7   : > { %v2890_v27 = vpack.c.bf16 %v514_v25, %v512_v24  ;;  %v516_v30 = vld [vmem:[#allocation5 + $0xa8] sm:$0xff]  ;;  %v518_v31 = vld [vmem:[#allocation5 + $0xb8] sm:$0xff]  ;;  %v515_v32 = vld [vmem:[#allocation5 + $0xa0] sm:$0xff]  ;;  %v2892_v34 = vpack.c.bf16 %v513_v29, %v511_v28 }
  0xc8   : > { %2881 = vmatpush1.bf16.msra.mxu0 %v2880_v14  ;;  %v517_v33 = vld [vmem:[#allocation5 + $0xb0] sm:$0xff]  ;;  %v520_v35 = vld [vmem:[#allocation5 + $0xc8] sm:$0xff]  ;;  %v522_v36 = vld [vmem:[#allocation5 + $0xd8] sm:$0xff]  ;;  %v2894_v38 = vpack.c.bf16 %v518_v31, %v516_v30  ;;  %s4386_s26 = scalar_lea.hbm %s4480_s30, %s2681_s25  ;;  %p3299_p11 = pneg %p3298_p10 }
  0xc9   : > { %2883 = vmatprep.subr.bf16.mxu0 %v2882_v15  ;;  %v3078_v37 = vld [vmem:[#allocation8 + $0x40] sm:$0xff]   ;;  %v3080_v40 = vld [vmem:[#allocation8 + $0x48] sm:$0xff]   ;;  %v2896_v44 = vpack.c.bf16 %v517_v33, %v515_v32  ;;  %v3082_v46 = vld [vmem:[#allocation8 + $0x50] sm:$0xff]   ;;  %v2898_v47 = vpack.c.bf16 %v522_v36, %v520_v35 }
  0xca   : > { %v3079_v39 = vld [vmem:[#allocation8] sm:$0xff]   ;;  %2682 = vmatprep.subr.bf16.mxu1 %v3078_v37  ;;  %v521_v42 = vld [vmem:[#allocation5 + $0xd0] sm:$0xff]  ;;  %v526_v48 = vld [vmem:[#allocation5 + $0xf8] sm:$0xff] }
  0xcb   : > { %v519_v41 = vld [vmem:[#allocation5 + $0xc0] sm:$0xff]  ;;  %2683 = vmatpush3.bf16.msra.mxu1 %v3079_v39  ;;  %v3081_v43 = vld [vmem:[#allocation8 + $0x8] sm:$0xff]   ;;  %v3083_v49 = vld [vmem:[#allocation8 + $0x10] sm:$0xff]  }
  0xcc   : > { %2885 = vmatpush1.bf16.msra.mxu0 %v2884_v20  ;;  %v524_v45 = vld [vmem:[#allocation5 + $0xe8] sm:$0xff]  ;;  %2684 = vmatprep.subr.bf16.mxu1 %v3080_v40  ;;  %v523_v50 = vld [vmem:[#allocation5 + $0xe0] sm:$0xff]  ;;  %v525_v51 = vld [vmem:[#allocation5 + $0xf0] sm:$0xff]  ;;  %v2900_v53 = vpack.c.bf16 %v521_v42, %v519_v41 }
  0xcd   : > { %2887 = vmatprep.subr.bf16.mxu0 %v2886_v21  ;;  %v3084_v52 = vld [vmem:[#allocation8 + $0x58] sm:$0xff]   ;;  %v2902_v54 = vpack.c.bf16 %v526_v48, %v524_v45  ;;  %v2904_v56 = vpack.c.bf16 %v525_v51, %v523_v50  ;;  %v480_v58 = vld [vmem:[%s3693_s29 + $0x8] sm:$0xff]  ;;  %v481_v59 = vld [vmem:[%s3693_s29 + $0x10] sm:$0xff] }
  0xce   : > { %v3085_v55 = vld [vmem:[#allocation8 + $0x18] sm:$0xff]   ;;  %v484_v62 = vld [vmem:[%s3693_s29 + $0x28] sm:$0xff]  ;;  %v485_v63 = vld [vmem:[%s3693_s29 + $0x30] sm:$0xff] }
  0xcf   : > { %2685 = vmatpush3.bf16.msra.mxu1 %v3081_v43  ;;  %v479_v57 = vld [vmem:[%s3693_s29] sm:$0xff]  ;;  %v482_v60 = vld [vmem:[%s3693_s29 + $0x18] sm:$0xff]  ;;  %v488_v3 = vld [vmem:[%s3693_s29 + $0x48] sm:$0xff] }
  0xd0   : > { %2889 = vmatpush1.bf16.msra.mxu0 %v2888_v26  ;;  %2686 = vmatprep.subr.bf16.mxu1 %v3082_v46  ;;  %v483_v61 = vld [vmem:[%s3693_s29 + $0x20] sm:$0xff]  ;;  %v486_v1 = vld [vmem:[%s3693_s29 + $0x38] sm:$0xff]  ;;  %v489_v4 = vld [vmem:[%s3693_s29 + $0x50] sm:$0xff] }
  0xd1   : > { %2891 = vmatprep.subr.bf16.mxu0 %v2890_v27  ;;  %v487_v2 = vld [vmem:[%s3693_s29 + $0x40] sm:$0xff]  ;;  %v490_v5 = vld [vmem:[%s3693_s29 + $0x58] sm:$0xff]  ;;  %v492_v7 = vld [vmem:[%s3693_s29 + $0x68] sm:$0xff] }
  0xd2   : > { %v491_v6 = vld [vmem:[%s3693_s29 + $0x60] sm:$0xff]  ;;  %v493_v8 = vld [vmem:[%s3693_s29 + $0x70] sm:$0xff]  ;;  %v494_v9 = vld [vmem:[%s3693_s29 + $0x78] sm:$0xff] }
  0xd3   : > { %2687 = vmatpush3.bf16.msra.mxu1 %v3083_v49  ;;  %v3086_v10 = vld [vmem:[#allocation8 + $0x60] sm:$0xff]   ;;  %v3088_v12 = vld [vmem:[#allocation8 + $0x68] sm:$0xff]   ;;  %v3090_v14 = vld [vmem:[#allocation8 + $0x70] sm:$0xff]  }
  0xd4   : > { %2893 = vmatpush1.bf16.msra.mxu0 %v2892_v34  ;;  %2688 = vmatprep.subr.bf16.mxu1 %v3084_v52  ;;  %v3087_v11 = vld [vmem:[#allocation8 + $0x20] sm:$0xff]   ;;  %v3089_v13 = vld [vmem:[#allocation8 + $0x28] sm:$0xff]   ;;  %v3091_v15 = vld [vmem:[#allocation8 + $0x30] sm:$0xff]  }
  0xd5   : > { %2895 = vmatprep.subr.bf16.mxu0 %v2894_v38  ;;  %v3092_v16 = vld [vmem:[#allocation8 + $0x78] sm:$0xff]   ;;  %v1153_v18 = vld [vmem:[#allocation10 + $0x8] sm:$0xff]  ;;  %v1152_v20 = vld [vmem:[#allocation10] sm:$0xff] }
  0xd6   : > { %v3093_v17 = vld [vmem:[#allocation8 + $0x38] sm:$0xff]   ;;  %v1157_v19 = vld [vmem:[#allocation10 + $0x28] sm:$0xff]  ;;  %v1156_v22 = vld [vmem:[#allocation10 + $0x20] sm:$0xff] }
  0xd7   : > { %2689 = vmatpush3.bf16.msra.mxu1 %v3085_v55  ;;  %v2906_v21 = vpack.c.bf16 %v1157_v19, %v1153_v18  ;;  %v1155_v23 = vld [vmem:[#allocation10 + $0x18] sm:$0xff]  ;;  %v2908_v25 = vpack.c.bf16 %v1156_v22, %v1152_v20  ;;  %v1161_v27 = vld [vmem:[#allocation10 + $0x48] sm:$0xff]  ;;  %v1160_v29 = vld [vmem:[#allocation10 + $0x40] sm:$0xff] }
  0xd8   : > { %2897 = vmatpush1.bf16.msra.mxu0 %v2896_v44  ;;  %2690 = vmatprep.subr.bf16.mxu1 %v3086_v10  ;;  %v1159_v24 = vld [vmem:[#allocation10 + $0x38] sm:$0xff]  ;;  %v1165_v28 = vld [vmem:[#allocation10 + $0x68] sm:$0xff]  ;;  %v1164_v30 = vld [vmem:[#allocation10 + $0x60] sm:$0xff] }
  0xd9   : > { %2899 = vmatprep.subr.bf16.mxu0 %v2898_v47  ;;  %v2938_v26 = vpack.c.bf16 %v1159_v24, %v1155_v23  ;;  %v2910_v31 = vpack.c.bf16 %v1165_v28, %v1161_v27  ;;  %v2912_v32 = vpack.c.bf16 %v1164_v30, %v1160_v29  ;;  %v1169_v33 = vld [vmem:[#allocation10 + $0x88] sm:$0xff]  ;;  %v1168_v36 = vld [vmem:[#allocation10 + $0x80] sm:$0xff]  ;;  %v764_v10 = vld [vmem:[#allocation7] sm:$0x3] }
  0xda   : > { %v1173_v34 = vld [vmem:[#allocation10 + $0xa8] sm:$0xff]  ;;  %v1172_v37 = vld [vmem:[#allocation10 + $0xa0] sm:$0xff] }
  0xdb   : > { %2691 = vmatpush3.bf16.msra.mxu1 %v3087_v11  ;;  %v2914_v35 = vpack.c.bf16 %v1173_v34, %v1169_v33  ;;  %v2916_v38 = vpack.c.bf16 %v1172_v37, %v1168_v36  ;;  %v1177_v39 = vld [vmem:[#allocation10 + $0xc8] sm:$0xff]  ;;  %v1176_v42 = vld [vmem:[#allocation10 + $0xc0] sm:$0xff] }
  0xdc   : > { %2901 = vmatpush1.bf16.msra.mxu0 %v2900_v53  ;;  %2692 = vmatprep.subr.bf16.mxu1 %v3088_v12  ;;  %v1181_v40 = vld [vmem:[#allocation10 + $0xe8] sm:$0xff]  ;;  %v1180_v43 = vld [vmem:[#allocation10 + $0xe0] sm:$0xff] }
  0xdd   : > { %2903 = vmatprep.subr.bf16.mxu0 %v2902_v54  ;;  %v2918_v41 = vpack.c.bf16 %v1181_v40, %v1177_v39  ;;  %v1185_v44 = vld [vmem:[#allocation10 + $0x108] sm:$0xff]  ;;  %v2920_v46 = vpack.c.bf16 %v1180_v43, %v1176_v42  ;;  %v1184_v48 = vld [vmem:[#allocation10 + $0x100] sm:$0xff] }
  0xde   : > { %v1189_v45 = vld [vmem:[#allocation10 + $0x128] sm:$0xff]  ;;  %v1188_v49 = vld [vmem:[#allocation10 + $0x120] sm:$0xff] }
  0xdf   : > { %2693 = vmatpush3.bf16.msra.mxu1 %v3089_v13  ;;  %v2922_v47 = vpack.c.bf16 %v1189_v45, %v1185_v44  ;;  %v1193_v50 = vld [vmem:[#allocation10 + $0x148] sm:$0xff]  ;;  %v2924_v52 = vpack.c.bf16 %v1188_v49, %v1184_v48  ;;  %v1192_v54 = vld [vmem:[#allocation10 + $0x140] sm:$0xff] }
  0xe0   : > { %2905 = vmatpush1.bf16.msra.mxu0 %v2904_v56  ;;  %2694 = vmatprep.subr.bf16.mxu1 %v3090_v14  ;;  %v1197_v51 = vld [vmem:[#allocation10 + $0x168] sm:$0xff]  ;;  %v1196_v55 = vld [vmem:[#allocation10 + $0x160] sm:$0xff] }
  0xe1   : > { %2907 = vmatprep.subr.bf16.mxu0 %v2906_v21  ;;  %v2926_v53 = vpack.c.bf16 %v1197_v51, %v1193_v50  ;;  %v1201_v56 = vld [vmem:[#allocation10 + $0x188] sm:$0xff]  ;;  %v1154_v50 = vld [vmem:[#allocation10 + $0x10] sm:$0xff] }
  0xe2   : > { %v1158_v51 = vld [vmem:[#allocation10 + $0x30] sm:$0xff] }
  0xe3   : > { %592 = vmatmul.mubr.f32.vlgmr.msra.gmra.mrb[0].mxu0 %v479_v57  ;;  %2695 = vmatpush3.bf16.msra.mxu1 %v3091_v15  ;;  %v1205_v57 = vld [vmem:[#allocation10 + $0x1a8] sm:$0xff] }
  0xe4   : > { %597 = vmatprep.mubr.f32.mxu0 %v3390_v0  ;;  %2696 = vmatprep.subr.bf16.mxu1 %v3092_v16 }
  0xe5   : > { %2909 = vmatpush1.bf16.msra.mxu0 %v2908_v25 }
  0xe6   : > { %2911 = vmatprep.subr.bf16.mxu0 %v2910_v31 }
  0xe7   : > { %598 = vmatmul.mubr.f32.gmra.mrb[2].mxu0 %v480_v58  ;;  %2697 = vmatpush3.bf16.msra.mxu1 %v3093_v17  ;;  %v2928_v58 = vpack.c.bf16 %v1196_v55, %v1192_v54 }
  0xe8   : > { %603 = vmatprep.mubr.f32.mxu0 %v3390_v0  ;;  %2939 = vmatprep.subr.bf16.mxu1 %v2938_v26 }
  0xe9   : > { %2913 = vmatpush1.bf16.msra.mxu0 %v2912_v32 }
  0xea   : > { %2915 = vmatprep.subr.bf16.mxu0 %v2914_v35 }
  0xeb   : > { %604 = vmatmul.mubr.f32.gmra.mrb[4].mxu0 %v481_v59  ;;  %v2930_v59 = vpack.c.bf16 %v1205_v57, %v1201_v56  ;;  %v1163_v57 = vld [vmem:[#allocation10 + $0x58] sm:$0xff] }
  0xec   : > { %609 = vmatprep.mubr.f32.mxu0 %v3390_v0 }
  0xed   : > { %2917 = vmatpush1.bf16.msra.mxu0 %v2916_v38 }
  0xee   : > { %2919 = vmatprep.subr.bf16.mxu0 %v2918_v41 }
  0xef   : > { %610 = vmatmul.mubr.f32.gmra.mrb[6].mxu0 %v482_v60  ;;  %v1200_v60 = vld [vmem:[#allocation10 + $0x180] sm:$0xff] }
  0xf0   : > { %615 = vmatprep.mubr.f32.mxu0 %v3390_v0 }
  0xf1   : > { %2921 = vmatpush1.bf16.msra.mxu0 %v2920_v46 }
  0xf2   : > { %2923 = vmatprep.subr.bf16.mxu0 %v2922_v47 }
  0xf3   : > { %616 = vmatmul.mubr.f32.gmra.mrb[8].mxu0 %v483_v61  ;;  %v1204_v61 = vld [vmem:[#allocation10 + $0x1a0] sm:$0xff] }
  0xf4   : > { %621 = vmatprep.mubr.f32.mxu0 %v3390_v0 }
  0xf5   : > { %2925 = vmatpush1.bf16.msra.mxu0 %v2924_v52 }
  0xf6   : > { %2927 = vmatprep.subr.bf16.mxu0 %v2926_v53 }
  0xf7   : > { %622 = vmatmul.mubr.f32.gmra.mrb[10].mxu0 %v484_v62  ;;  %v1209_v62 = vld [vmem:[#allocation10 + $0x1c8] sm:$0xff] }
  0xf8   : > { %627 = vmatprep.mubr.f32.mxu0 %v3390_v0 }
  0xf9   : > { %2929 = vmatpush1.bf16.msra.mxu0 %v2928_v58  ;;  %v1167_v58 = vld [vmem:[#allocation10 + $0x78] sm:$0xff] }
  0xfa   : > { %2931 = vmatprep.subr.bf16.mxu0 %v2930_v59 }
  0xfb   : > { %628 = vmatmul.mubr.f32.gmra.mrb[12].mxu0 %v485_v63  ;;  %v1213_v63 = vld [vmem:[#allocation10 + $0x1e8] sm:$0xff] }
  0xfc   : > { %633 = vmatprep.mubr.f32.mxu0 %v3390_v0 }
  0xff   : > { %634 = vmatmul.mubr.f32.gmra.mrb[14].mxu0 %v486_v1  ;;  %v2932_v1 = vpack.c.bf16 %v1204_v61, %v1200_v60 }
 0x100   : > { %639 = vmatprep.mubr.f32.mxu0 %v3390_v0 }
 0x101   : > { %2933 = vmatpush1.bf16.msra.mxu0 %v2932_v1 }
 0x103   : > { %640 = vmatmul.mubr.f32.gmra.mrb[16].mxu0 %v487_v2  ;;  %v2934_v2 = vpack.c.bf16 %v1213_v63, %v1209_v62 }
 0x104   : > { %645 = vmatprep.mubr.f32.mxu0 %v3390_v0 }
 0x105   : > { %2935 = vmatprep.subr.bf16.mxu0 %v2934_v2 }
 0x107   : > { %646 = vmatmul.mubr.f32.gmra.mrb[18].mxu0 %v488_v3  ;;  %v1208_v3 = vld [vmem:[#allocation10 + $0x1c0] sm:$0xff] }
 0x108   : > { %651 = vmatprep.mubr.f32.mxu0 %v3390_v0 }
 0x10b   : > { %652 = vmatmul.mubr.f32.gmra.mrb[20].mxu0 %v489_v4  ;;  %v1212_v4 = vld [vmem:[#allocation10 + $0x1e0] sm:$0xff] }
 0x10c   : > { %657 = vmatprep.mubr.f32.mxu0 %v3390_v0 }
 0x10f   : > { %658 = vmatmul.mubr.f32.gmra.mrb[22].mxu0 %v490_v5  ;;  %v2936_v5 = vpack.c.bf16 %v1212_v4, %v1208_v3  ;;  %v2940_v3 = vpack.c.bf16 %v1158_v51, %v1154_v50  ;;  %v1162_v4 = vld [vmem:[#allocation10 + $0x50] sm:$0xff] }
 0x110   : > { %663 = vmatprep.mubr.f32.mxu0 %v3390_v0 }
 0x111   : > { %2937 = vmatpush1.bf16.msra.mxu0 %v2936_v5  ;;  %v1166_v5 = vld [vmem:[#allocation10 + $0x70] sm:$0xff] }
 0x113   : > { %664 = vmatmul.mubr.f32.gmra.mrb[24].mxu0 %v491_v6  ;;  %v690_v6 = vlaneseq }
 0x114   : > { %669 = vmatprep.mubr.f32.mxu0 %v3390_v0 }
 0x117   : > { %670 = vmatmul.mubr.f32.gmra.mrb[26].mxu0 %v492_v7  ;;  %v3744_v7 = vshrl.u32 %v690_v6, 7 }
 0x118   : > { %675 = vmatprep.mubr.f32.mxu0 %v3390_v0 }
 0x119   : > { %v3753_v11 = vsub.s32 1, %v3744_v7 }
 0x11b   : > { %676 = vmatmul.mubr.f32.gmra.mrb[28].mxu0 %v493_v8  ;;  %v3747_v8 = vsub.s32 0, %v3744_v7  ;;  %v3765_v15 = vrot.slane %v764_v10, %v3753_v11 }
 0x11c   : > { %681 = vmatprep.mubr.f32.mxu0 %v3390_v0 }
 0x11d   : > { %v3759_v13 = vrot.slane %v764_v10, %v3747_v8 }
 0x11f   : > { %682 = vmatmul.mubr.f32.gmra.mrb[30].mxu0 %v494_v9  ;;  %v688_v9 = vld [vmem:[%s4436_s2] sm:$0x3] }
 0x120   : > { %1280 = vmatprep.mubr.f32.mxu0 %v3390_v0  ;;  %v3756_v12 = vrot.slane %v688_v9, %v3747_v8  ;;  %v3762_v14 = vrot.slane %v688_v9, %v3753_v11 }
 0x1b6   : > { %v593_v16 = vpop.f32.mrb[0].mxu0 }
 0x1b7   : > { %v700_v17 = vsub.f32 %v593_v16, %v3756_v12  ;;  %v776_v18 = vsub.f32 %v3759_v13, %v593_v16  ;;  %v595_v19 = vpop.f32.mrb[1].mxu0  ;;  %v2942_v16 = vpack.c.bf16 %v1167_v58, %v1163_v57 }
 0x1b8   : > { %v701_v20 = vsub.f32 %v595_v19, %v3762_v14  ;;  %v777_v21 = vsub.f32 %v3765_v15, %v595_v19 }
 0x1b9   : > { %v732_v22 = vmax.f32 %v700_v17, 0.0  ;;  %v808_v23 = vmax.f32 %v776_v18, 0.0  ;;  %v1171_v17 = vld [vmem:[#allocation10 + $0x98] sm:$0xff] }
 0x1ba   : > { %v733_v24 = vmax.f32 %v701_v20, 0.0  ;;  %v809_v25 = vmax.f32 %v777_v21, 0.0  ;;  %v599_v26 = vpop.f32.mrb[2].mxu0  ;;  %v1175_v18 = vld [vmem:[#allocation10 + $0xb8] sm:$0xff] }
 0x1bb   : > { %v702_v27 = vsub.f32 %v599_v26, %v3756_v12  ;;  %v778_v28 = vsub.f32 %v3759_v13, %v599_v26  ;;  %v601_v29 = vpop.f32.mrb[3].mxu0  ;;  %v840_v32 = vmul.f32 %v808_v23, %v732_v22 }
 0x1bc   : > { %v703_v30 = vsub.f32 %v601_v29, %v3762_v14  ;;  %v779_v31 = vsub.f32 %v3765_v15, %v601_v29  ;;  %v841_v38 = vmul.f32 %v809_v25, %v733_v24 }
 0x1bd   : > { %v734_v33 = vmax.f32 %v702_v27, 0.0  ;;  %v810_v34 = vmax.f32 %v778_v28, 0.0  ;;  %v872_v46 = vmul.f32 %v840_v32, %v840_v32  ;;  %v2944_v27 = vpack.c.bf16 %v1166_v5, %v1162_v4 }
 0x1be   : > { %v735_v35 = vmax.f32 %v703_v30, 0.0  ;;  %v811_v36 = vmax.f32 %v779_v31, 0.0  ;;  %v605_v37 = vpop.f32.mrb[4].mxu0  ;;  %v873_v55 = vmul.f32 %v841_v38, %v841_v38  ;;  %v2946_v31 = vpack.c.bf16 %v1175_v18, %v1171_v17 }
 0x1bf   : > { %v842_v39 = vmul.f32 %v810_v34, %v734_v33  ;;  %v704_v40 = vsub.f32 %v605_v37, %v3756_v12  ;;  %v780_v41 = vsub.f32 %v3759_v13, %v605_v37  ;;  %v607_v42 = vpop.f32.mrb[5].mxu0  ;;  %v1174_v37 = vld [vmem:[#allocation10 + $0xb0] sm:$0xff] }
 0x1c0   : > { %v705_v43 = vsub.f32 %v607_v42, %v3762_v14  ;;  %v781_v44 = vsub.f32 %v3765_v15, %v607_v42  ;;  %v843_v45 = vmul.f32 %v811_v36, %v735_v35  ;;  %v1170_v36 = vld [vmem:[#allocation10 + $0x90] sm:$0xff] }
 0x1c1   : > { %v874_v47 = vmul.f32 %v842_v39, %v842_v39  ;;  %v736_v48 = vmax.f32 %v704_v40, 0.0  ;;  %v812_v49 = vmax.f32 %v780_v41, 0.0 }
 0x1c2   : > { %v737_v52 = vmax.f32 %v705_v43, 0.0  ;;  %v813_v53 = vmax.f32 %v781_v44, 0.0  ;;  %v611_v54 = vpop.f32.mrb[6].mxu0  ;;  %v875_v56 = vmul.f32 %v843_v45, %v843_v45  ;;  %v1179_v43 = vld [vmem:[#allocation10 + $0xd8] sm:$0xff] }
 0x1c3   : > { %v706_v59 = vsub.f32 %v611_v54, %v3756_v12  ;;  %v782_v60 = vsub.f32 %v3759_v13, %v611_v54  ;;  %v613_v61 = vpop.f32.mrb[7].mxu0  ;;  %v904_v62 = vpack.c.bf16 %v874_v47, %v872_v46  ;;  %v844_v6 = vmul.f32 %v812_v49, %v736_v48  ;;  %v1183_v44 = vld [vmem:[#allocation10 + $0xf8] sm:$0xff]  ;;  %v1182_v54 = vld [vmem:[#allocation10 + $0xf0] sm:$0xff] }
 0x1c4   : > { %v707_v63 = vsub.f32 %v613_v61, %v3762_v14  ;;  %v783_v1 = vsub.f32 %v3765_v15, %v613_v61  ;;  %v905_v2 = vpack.c.bf16 %v875_v56, %v873_v55  ;;  %v845_v19 = vmul.f32 %v813_v53, %v737_v52  ;;  %v1178_v53 = vld [vmem:[#allocation10 + $0xd0] sm:$0xff] }
 0x1c5   : > { %v738_v9 = vmax.f32 %v706_v59, 0.0  ;;  %v814_v10 = vmax.f32 %v782_v60, 0.0  ;;  %v876_v32 = vmul.f32 %v844_v6, %v844_v6  ;;  %v2948_v52 = vpack.c.bf16 %v1174_v37, %v1170_v36  ;;  %v1187_v59 = vld [vmem:[#allocation10 + $0x118] sm:$0xff] }
 0x1c6   : > { %v739_v20 = vmax.f32 %v707_v63, 0.0  ;;  %v815_v21 = vmax.f32 %v783_v1, 0.0  ;;  %v617_v22 = vpop.f32.mrb[8].mxu0  ;;  %1087 = vmatprep.mubr.bf16.mxu1 %v905_v2  ;;  %v877_v38 = vmul.f32 %v845_v19, %v845_v19  ;;  %v2950_v58 = vpack.c.bf16 %v1183_v44, %v1179_v43  ;;  %v1191_v60 = vld [vmem:[#allocation10 + $0x138] sm:$0xff] }
 0x1c7   : > { %v846_v23 = vmul.f32 %v814_v10, %v738_v9  ;;  %v708_v24 = vsub.f32 %v617_v22, %v3756_v12  ;;  %v784_v25 = vsub.f32 %v3759_v13, %v617_v22  ;;  %v619_v26 = vpop.f32.mrb[9].mxu0  ;;  %1088 = vmatmul.mubr.bf16.vlgmr.msra.gmra.mrb[0].mxu1 %v904_v62  ;;  %v2952_v6 = vpack.c.bf16 %v1182_v54, %v1178_v53  ;;  %v1186_v22 = vld [vmem:[#allocation10 + $0x110] sm:$0xff] }
 0x1c8   : > { %v847_v28 = vmul.f32 %v815_v21, %v739_v20  ;;  %v709_v29 = vsub.f32 %v619_v26, %v3762_v14  ;;  %v785_v30 = vsub.f32 %v3765_v15, %v619_v26  ;;  %2941 = vmatpush1.bf16.msra.mxu1 %v2940_v3  ;;  %v2954_v17 = vpack.c.bf16 %v1191_v60, %v1187_v59 }
 0x1c9   : > { %v878_v33 = vmul.f32 %v846_v23, %v846_v23  ;;  %v740_v34 = vmax.f32 %v708_v24, 0.0  ;;  %v816_v35 = vmax.f32 %v784_v25, 0.0  ;;  %2943 = vmatprep.subr.bf16.mxu1 %v2942_v16  ;;  %v1190_v23 = vld [vmem:[#allocation10 + $0x130] sm:$0xff] }
 0x1ca   : > { %v879_v39 = vmul.f32 %v847_v28, %v847_v28  ;;  %v741_v40 = vmax.f32 %v709_v29, 0.0  ;;  %v817_v41 = vmax.f32 %v785_v30, 0.0  ;;  %v623_v42 = vpop.f32.mrb[10].mxu0  ;;  %v1195_v29 = vld [vmem:[#allocation10 + $0x158] sm:$0xff] }
 0x1cb   : > { %v710_v45 = vsub.f32 %v623_v42, %v3756_v12  ;;  %v786_v46 = vsub.f32 %v3759_v13, %v623_v42  ;;  %v625_v47 = vpop.f32.mrb[11].mxu0  ;;  %v906_v48 = vpack.c.bf16 %v878_v33, %v876_v32  ;;  %v848_v55 = vmul.f32 %v816_v35, %v740_v34  ;;  %v1199_v30 = vld [vmem:[#allocation10 + $0x178] sm:$0xff] }
 0x1cc   : > { %v711_v49 = vsub.f32 %v625_v47, %v3762_v14  ;;  %v787_v50 = vsub.f32 %v3765_v15, %v625_v47  ;;  %v907_v51 = vpack.c.bf16 %v879_v39, %v877_v38  ;;  %2945 = vmatpush1.bf16.msra.mxu1 %v2944_v27  ;;  %v849_v61 = vmul.f32 %v817_v41, %v741_v40  ;;  %v1194_v39 = vld [vmem:[#allocation10 + $0x150] sm:$0xff] }
 0x1cd   : > { %v742_v56 = vmax.f32 %v710_v45, 0.0  ;;  %v818_v57 = vmax.f32 %v786_v46, 0.0  ;;  %2947 = vmatprep.subr.bf16.mxu1 %v2946_v31  ;;  %v880_v18 = vmul.f32 %v848_v55, %v848_v55  ;;  %v2956_v38 = vpack.c.bf16 %v1190_v23, %v1186_v22  ;;  %v1198_v40 = vld [vmem:[#allocation10 + $0x170] sm:$0xff]  ;;  %v1203_v45 = vld [vmem:[#allocation10 + $0x198] sm:$0xff] }
 0x1ce   : > { %v743_v62 = vmax.f32 %v711_v49, 0.0  ;;  %v819_v63 = vmax.f32 %v787_v50, 0.0  ;;  %v629_v1 = vpop.f32.mrb[12].mxu0  ;;  %1095 = vmatprep.mubr.bf16.mxu1 %v907_v51  ;;  %v881_v24 = vmul.f32 %v849_v61, %v849_v61  ;;  %v2958_v44 = vpack.c.bf16 %v1199_v30, %v1195_v29  ;;  %v1207_v46 = vld [vmem:[#allocation10 + $0x1b8] sm:$0xff] }
 0x1cf   : > { %v850_v2 = vmul.f32 %v818_v57, %v742_v56  ;;  %v712_v3 = vsub.f32 %v629_v1, %v3756_v12  ;;  %v788_v4 = vsub.f32 %v3759_v13, %v629_v1  ;;  %v631_v5 = vpop.f32.mrb[13].mxu0  ;;  %1096 = vmatmul.mubr.bf16.gmra.mrb[4].mxu1 %v906_v48  ;;  %v2960_v55 = vpack.c.bf16 %v1198_v40, %v1194_v39  ;;  %v1202_v1 = vld [vmem:[#allocation10 + $0x190] sm:$0xff] }
 0x1d0   : > { %v851_v9 = vmul.f32 %v819_v63, %v743_v62  ;;  %v713_v10 = vsub.f32 %v631_v5, %v3762_v14  ;;  %v789_v16 = vsub.f32 %v3765_v15, %v631_v5  ;;  %2949 = vmatpush1.bf16.msra.mxu1 %v2948_v52  ;;  %v2962_v59 = vpack.c.bf16 %v1207_v46, %v1203_v45 }
 0x1d1   : > { %v882_v19 = vmul.f32 %v850_v2, %v850_v2  ;;  %v744_v20 = vmax.f32 %v712_v3, 0.0  ;;  %v820_v21 = vmax.f32 %v788_v4, 0.0  ;;  %2951 = vmatprep.subr.bf16.mxu1 %v2950_v58  ;;  %v1206_v2 = vld [vmem:[#allocation10 + $0x1b0] sm:$0xff] }
 0x1d2   : > { %v883_v25 = vmul.f32 %v851_v9, %v851_v9  ;;  %v745_v26 = vmax.f32 %v713_v10, 0.0  ;;  %v821_v27 = vmax.f32 %v789_v16, 0.0  ;;  %v635_v28 = vpop.f32.mrb[14].mxu0  ;;  %v1211_v10 = vld [vmem:[#allocation10 + $0x1d8] sm:$0xff] }
 0x1d3   : > { %v714_v31 = vsub.f32 %v635_v28, %v3756_v12  ;;  %v790_v32 = vsub.f32 %v3759_v13, %v635_v28  ;;  %v637_v33 = vpop.f32.mrb[15].mxu0  ;;  %v908_v34 = vpack.c.bf16 %v882_v19, %v880_v18  ;;  %v852_v41 = vmul.f32 %v820_v21, %v744_v20  ;;  %v1215_v16 = vld [vmem:[#allocation10 + $0x1f8] sm:$0xff] }
 0x1d4   : > { %v715_v35 = vsub.f32 %v637_v33, %v3762_v14  ;;  %v791_v36 = vsub.f32 %v3765_v15, %v637_v33  ;;  %v909_v37 = vpack.c.bf16 %v883_v25, %v881_v24  ;;  %2953 = vmatpush1.bf16.msra.mxu1 %v2952_v6  ;;  %v853_v47 = vmul.f32 %v821_v27, %v745_v26 }
 0x1d5   : > { %v746_v42 = vmax.f32 %v714_v31, 0.0  ;;  %v822_v43 = vmax.f32 %v790_v32, 0.0  ;;  %2955 = vmatprep.subr.bf16.mxu1 %v2954_v17  ;;  %v884_v60 = vmul.f32 %v852_v41, %v852_v41  ;;  %v2964_v24 = vpack.c.bf16 %v1206_v2, %v1202_v1 }
 0x1d6   : > { %v747_v48 = vmax.f32 %v715_v35, 0.0  ;;  %v823_v49 = vmax.f32 %v791_v36, 0.0  ;;  %v641_v50 = vpop.f32.mrb[16].mxu0  ;;  %1103 = vmatprep.mubr.bf16.mxu1 %v909_v37  ;;  %v885_v3 = vmul.f32 %v853_v47, %v853_v47  ;;  %v2966_v28 = vpack.c.bf16 %v1215_v16, %v1211_v10 }
 0x1d7   : > { %v854_v51 = vmul.f32 %v822_v43, %v746_v42  ;;  %v716_v52 = vsub.f32 %v641_v50, %v3756_v12  ;;  %v792_v53 = vsub.f32 %v3759_v13, %v641_v50  ;;  %v643_v54 = vpop.f32.mrb[17].mxu0  ;;  %1104 = vmatmul.mubr.bf16.gmra.mrb[8].mxu1 %v908_v34 }
 0x1d8   : > { %v855_v56 = vmul.f32 %v823_v49, %v747_v48  ;;  %v717_v57 = vsub.f32 %v643_v54, %v3762_v14  ;;  %v793_v58 = vsub.f32 %v3765_v15, %v643_v54  ;;  %2957 = vmatpush1.bf16.msra.mxu1 %v2956_v38 }
 0x1d9   : > { %v886_v61 = vmul.f32 %v854_v51, %v854_v51  ;;  %v748_v62 = vmax.f32 %v716_v52, 0.0  ;;  %v824_v63 = vmax.f32 %v792_v53, 0.0  ;;  %2959 = vmatprep.subr.bf16.mxu1 %v2958_v44 }
 0x1da   : > { %v887_v4 = vmul.f32 %v855_v56, %v855_v56  ;;  %v749_v5 = vmax.f32 %v717_v57, 0.0  ;;  %v825_v6 = vmax.f32 %v793_v58, 0.0  ;;  %v647_v9 = vpop.f32.mrb[18].mxu0 }
 0x1db   : > { %v718_v17 = vsub.f32 %v647_v9, %v3756_v12  ;;  %v794_v18 = vsub.f32 %v3759_v13, %v647_v9  ;;  %v649_v19 = vpop.f32.mrb[19].mxu0  ;;  %v910_v20 = vpack.c.bf16 %v886_v61, %v884_v60  ;;  %v856_v25 = vmul.f32 %v824_v63, %v748_v62 }
 0x1dc   : > { %v719_v21 = vsub.f32 %v649_v19, %v3762_v14  ;;  %v795_v22 = vsub.f32 %v3765_v15, %v649_v19  ;;  %v911_v23 = vpack.c.bf16 %v887_v4, %v885_v3  ;;  %2961 = vmatpush1.bf16.msra.mxu1 %v2960_v55  ;;  %v857_v29 = vmul.f32 %v825_v6, %v749_v5 }
 0x1dd   : > { %v750_v26 = vmax.f32 %v718_v17, 0.0  ;;  %v826_v27 = vmax.f32 %v794_v18, 0.0  ;;  %2963 = vmatprep.subr.bf16.mxu1 %v2962_v59  ;;  %v888_v40 = vmul.f32 %v856_v25, %v856_v25 }
 0x1de   : > { %v751_v30 = vmax.f32 %v719_v21, 0.0  ;;  %v827_v31 = vmax.f32 %v795_v22, 0.0  ;;  %v653_v32 = vpop.f32.mrb[20].mxu0  ;;  %1111 = vmatprep.mubr.bf16.mxu1 %v911_v23  ;;  %v889_v44 = vmul.f32 %v857_v29, %v857_v29 }
 0x1df   : > { %v858_v33 = vmul.f32 %v826_v27, %v750_v26  ;;  %v720_v34 = vsub.f32 %v653_v32, %v3756_v12  ;;  %v796_v35 = vsub.f32 %v3759_v13, %v653_v32  ;;  %v655_v36 = vpop.f32.mrb[21].mxu0  ;;  %1112 = vmatmul.mubr.bf16.gmra.mrb[12].mxu1 %v910_v20 }
 0x1e0   : > { %v859_v37 = vmul.f32 %v827_v31, %v751_v30  ;;  %v721_v38 = vsub.f32 %v655_v36, %v3762_v14  ;;  %v797_v39 = vsub.f32 %v3765_v15, %v655_v36  ;;  %2965 = vmatpush1.bf16.msra.mxu1 %v2964_v24 }
 0x1e1   : > { %v890_v41 = vmul.f32 %v858_v33, %v858_v33  ;;  %v752_v42 = vmax.f32 %v720_v34, 0.0  ;;  %v828_v43 = vmax.f32 %v796_v35, 0.0  ;;  %2967 = vmatprep.subr.bf16.mxu1 %v2966_v28 }
 0x1e2   : > { %v891_v45 = vmul.f32 %v859_v37, %v859_v37  ;;  %v753_v46 = vmax.f32 %v721_v38, 0.0  ;;  %v829_v47 = vmax.f32 %v797_v39, 0.0  ;;  %v659_v48 = vpop.f32.mrb[22].mxu0 }
 0x1e3   : > { %v722_v49 = vsub.f32 %v659_v48, %v3756_v12  ;;  %v798_v50 = vsub.f32 %v3759_v13, %v659_v48  ;;  %v661_v51 = vpop.f32.mrb[23].mxu0  ;;  %v912_v52 = vpack.c.bf16 %v890_v41, %v888_v40  ;;  %v860_v56 = vmul.f32 %v828_v43, %v752_v42 }
 0x1e4   : > { %v723_v53 = vsub.f32 %v661_v51, %v3762_v14  ;;  %v799_v54 = vsub.f32 %v3765_v15, %v661_v51  ;;  %v913_v55 = vpack.c.bf16 %v891_v45, %v889_v44  ;;  %v861_v59 = vmul.f32 %v829_v47, %v753_v46 }
 0x1e5   : > { %v754_v57 = vmax.f32 %v722_v49, 0.0  ;;  %v830_v58 = vmax.f32 %v798_v50, 0.0  ;;  %v892_v9 = vmul.f32 %v860_v56, %v860_v56 }
 0x1e6   : > { %v755_v60 = vmax.f32 %v723_v53, 0.0  ;;  %v831_v61 = vmax.f32 %v799_v54, 0.0  ;;  %v665_v62 = vpop.f32.mrb[24].mxu0  ;;  %1119 = vmatprep.mubr.bf16.mxu1 %v913_v55  ;;  %v893_v18 = vmul.f32 %v861_v59, %v861_v59 }
 0x1e7   : > { %v862_v63 = vmul.f32 %v830_v58, %v754_v57  ;;  %v724_v1 = vsub.f32 %v665_v62, %v3756_v12  ;;  %v800_v2 = vsub.f32 %v3759_v13, %v665_v62  ;;  %v667_v3 = vpop.f32.mrb[25].mxu0  ;;  %1120 = vmatmul.mubr.bf16.gmra.mrb[16].mxu1 %v912_v52 }
 0x1e8   : > { %v863_v4 = vmul.f32 %v831_v61, %v755_v60  ;;  %v725_v5 = vsub.f32 %v667_v3, %v3762_v14  ;;  %v801_v6 = vsub.f32 %v3765_v15, %v667_v3 }
 0x1e9   : > { %v894_v10 = vmul.f32 %v862_v63, %v862_v63  ;;  %v756_v16 = vmax.f32 %v724_v1, 0.0  ;;  %v832_v17 = vmax.f32 %v800_v2, 0.0 }
 0x1ea   : > { %v895_v19 = vmul.f32 %v863_v4, %v863_v4  ;;  %v757_v20 = vmax.f32 %v725_v5, 0.0  ;;  %v833_v21 = vmax.f32 %v801_v6, 0.0  ;;  %v671_v22 = vpop.f32.mrb[26].mxu0 }
 0x1eb   : > { %v726_v23 = vsub.f32 %v671_v22, %v3756_v12  ;;  %v802_v24 = vsub.f32 %v3759_v13, %v671_v22  ;;  %v673_v25 = vpop.f32.mrb[27].mxu0  ;;  %v914_v26 = vpack.c.bf16 %v894_v10, %v892_v9  ;;  %v864_v30 = vmul.f32 %v832_v17, %v756_v16  ;;  %v3094_v17 = vld [vmem:[#allocation11 + $0x40] sm:$0xff]  }
 0x1ec   : > { %v727_v27 = vsub.f32 %v673_v25, %v3762_v14  ;;  %v803_v28 = vsub.f32 %v3765_v15, %v673_v25  ;;  %v915_v29 = vpack.c.bf16 %v895_v19, %v893_v18  ;;  %v865_v33 = vmul.f32 %v833_v21, %v757_v20  ;;  %v3096_v18 = vld [vmem:[#allocation11 + $0xc0] sm:$0xff]   ;;  %2746 = vmatprep.subr.bf16.mxu0 %v3094_v17  ;;  %v3835_v20 = vld [vmem:[%s4439_s5] ss:$0 sm:$0xff] }
 0x1ed   : > { %v758_v31 = vmax.f32 %v726_v23, 0.0  ;;  %v834_v32 = vmax.f32 %v802_v24, 0.0  ;;  %v896_v44 = vmul.f32 %v864_v30, %v864_v30  ;;  %v3100_v30 = vld [vmem:[#allocation11 + $0xc8] sm:$0xff]  }
 0x1ee   : > { %v759_v34 = vmax.f32 %v727_v27, 0.0  ;;  %v835_v35 = vmax.f32 %v803_v28, 0.0  ;;  %v677_v36 = vpop.f32.mrb[28].mxu0  ;;  %1127 = vmatprep.mubr.bf16.mxu1 %v915_v29  ;;  %v897_v48 = vmul.f32 %v865_v33, %v865_v33  ;;  %v3095_v27 = vld [vmem:[#allocation11] sm:$0xff]   ;;  %v3098_v29 = vld [vmem:[#allocation11 + $0x48] sm:$0xff]  }
 0x1ef   : > { %v866_v37 = vmul.f32 %v834_v32, %v758_v31  ;;  %v728_v38 = vsub.f32 %v677_v36, %v3756_v12  ;;  %v804_v39 = vsub.f32 %v3759_v13, %v677_v36  ;;  %v679_v40 = vpop.f32.mrb[29].mxu0  ;;  %1128 = vmatmul.mubr.bf16.gmra.mrb[20].mxu1 %v914_v26  ;;  %v3097_v28 = vld [vmem:[#allocation11 + $0x80] sm:$0xff]   ;;  %v3099_v33 = vld [vmem:[#allocation11 + $0x8] sm:$0xff]   ;;  %v3102_v36 = vld [vmem:[#allocation11 + $0x50] sm:$0xff]  }
 0x1f0   : > { %v867_v41 = vmul.f32 %v835_v35, %v759_v34  ;;  %v729_v42 = vsub.f32 %v679_v40, %v3762_v14  ;;  %v805_v43 = vsub.f32 %v3765_v15, %v679_v40  ;;  %v3101_v34 = vld [vmem:[#allocation11 + $0x88] sm:$0xff]  }
 0x1f1   : > { %v898_v45 = vmul.f32 %v866_v37, %v866_v37  ;;  %v760_v46 = vmax.f32 %v728_v38, 0.0  ;;  %v836_v47 = vmax.f32 %v804_v39, 0.0  ;;  %v3104_v37 = vld [vmem:[#allocation11 + $0xd0] sm:$0xff]  }
 0x1f2   : > { %v899_v49 = vmul.f32 %v867_v41, %v867_v41  ;;  %v761_v50 = vmax.f32 %v729_v42, 0.0  ;;  %v837_v51 = vmax.f32 %v805_v43, 0.0  ;;  %v683_v52 = vpop.f32.mrb[30].mxu0  ;;  %v3103_v43 = vld [vmem:[#allocation11 + $0x10] sm:$0xff]  }
 0x1f3   : > { %v730_v53 = vsub.f32 %v683_v52, %v3756_v12  ;;  %v806_v54 = vsub.f32 %v3759_v13, %v683_v52  ;;  %v685_v55 = vpop.f32.mrb[31].mxu0  ;;  %v916_v56 = vpack.c.bf16 %v898_v45, %v896_v44  ;;  %v868_v60 = vmul.f32 %v836_v47, %v760_v46  ;;  %v3105_v44 = vld [vmem:[#allocation11 + $0x90] sm:$0xff]   ;;  %v3106_v45 = vld [vmem:[#allocation11 + $0x58] sm:$0xff]   ;;  %v3110_v52 = vld [vmem:[#allocation11 + $0x60] sm:$0xff]  }
 0x1f4   : > { %v731_v57 = vsub.f32 %v685_v55, %v3762_v14  ;;  %v807_v58 = vsub.f32 %v3765_v15, %v685_v55  ;;  %v917_v59 = vpack.c.bf16 %v899_v49, %v897_v48  ;;  %v869_v63 = vmul.f32 %v837_v51, %v761_v50  ;;  %v1210_v14 = vld [vmem:[#allocation10 + $0x1d0] sm:$0xff]  ;;  %v3108_v46 = vld [vmem:[#allocation11 + $0xd8] sm:$0xff]  }
 0x1f5   : > { %v762_v61 = vmax.f32 %v730_v53, 0.0  ;;  %v838_v62 = vmax.f32 %v806_v54, 0.0  ;;  %v900_v12 = vmul.f32 %v868_v60, %v868_v60  ;;  %v1214_v15 = vld [vmem:[#allocation10 + $0x1f0] sm:$0xff]  ;;  %v3107_v49 = vld [vmem:[#allocation11 + $0x18] sm:$0xff]   ;;  %v3112_v53 = vld [vmem:[#allocation11 + $0xe0] sm:$0xff]  }
 0x1f6   : > { %v763_v1 = vmax.f32 %v731_v57, 0.0  ;;  %v839_v2 = vmax.f32 %v807_v58, 0.0  ;;  %1135 = vmatprep.mubr.bf16.mxu1 %v917_v59  ;;  %v901_v13 = vmul.f32 %v869_v63, %v869_v63  ;;  %v2968_v16 = vpack.c.bf16 %v1214_v15, %v1210_v14  ;;  %v3109_v50 = vld [vmem:[#allocation11 + $0x98] sm:$0xff]   ;;  %v3111_v59 = vld [vmem:[#allocation11 + $0x20] sm:$0xff]  }
 0x1f7   : > { %v870_v3 = vmul.f32 %v838_v62, %v762_v61  ;;  %1136 = vmatmul.mubr.bf16.gmra.mrb[24].mxu1 %v916_v56  ;;  %v3113_v60 = vld [vmem:[#allocation11 + $0xa0] sm:$0xff]   ;;  %v3114_v61 = vld [vmem:[#allocation11 + $0x68] sm:$0xff]  }
 0x1f8   : > { %v871_v4 = vmul.f32 %v839_v2, %v763_v1  ;;  %2969 = vmatpush1.bf16.msra.mxu1 %v2968_v16  ;;  %v3116_v62 = vld [vmem:[#allocation11 + $0xe8] sm:$0xff]  }
 0x1f9   : > { %v902_v5 = vmul.f32 %v870_v3, %v870_v3  ;;  %2810 = vmatprep.subr.bf16.mxu1 %v3096_v18  ;;  %v3115_v2 = vld [vmem:[#allocation11 + $0x28] sm:$0xff]  }
 0x1fa   : > { %v903_v6 = vmul.f32 %v871_v4, %v871_v4  ;;  %v3117_v3 = vld [vmem:[#allocation11 + $0xa8] sm:$0xff]  }
 0x1fb   : > { %v918_v9 = vpack.c.bf16 %v902_v5, %v900_v12 }
 0x1fc   : > { %v919_v10 = vpack.c.bf16 %v903_v6, %v901_v13 }
 0x1fe   : > { %1143 = vmatprep.mubr.bf16.mxu1 %v919_v10 }
 0x1ff   : > { %1144 = vmatmul.mubr.bf16.gmra.mrb[28].mxu1 %v918_v9 }
 0x200   : > { %1441 = vmatprep.mubr.f32.mxu1 %v3390_v0 }
 0x29a   : > { %v2698_v19 = vpop.f32.mrb[0].mxu1 }
 0x29b   : > { %v2699_v21 = vpop.f32.mrb[1].mxu1 }
 0x29c   : > { %v2700_v22 = vadd.f32 %v2699_v21, %v2698_v19  ;;  %v2701_v23 = vpop.f32.mrb[2].mxu1 }
 0x29d   : > { %v2702_v24 = vpop.f32.mrb[3].mxu1 }
 0x29e   : > { %v1090_v25 = vadd.f32 %v2700_v22, %v3835_v20  ;;  %v2703_v26 = vadd.f32 %v2702_v24, %v2701_v23 }
 0x2a0   : > { %1281 = vmatmul.mubr.f32.vlgmr.msra.gmra.mrb[32].mxu0 %v1090_v25  ;;  %1442 = vmatmul.mubr.f32.vlgmr.msra.gmra.mrb[32].mxu1 %v1090_v25  ;;  %v1093_v31 = vadd.f32 %v2703_v26, %v3835_v20 }
 0x2a1   : > { %1286 = vmatprep.mubr.f32.mxu0 %v3390_v0  ;;  %1447 = vmatprep.mubr.f32.mxu1 %v3390_v0 }
 0x2a2   : > { %v2704_v32 = vpop.f32.mrb[4].mxu1  ;;  %2747 = vmatpush3.bf16.msra.mxu0 %v3095_v27  ;;  %2811 = vmatpush3.bf16.msra.mxu1 %v3097_v28 }
 0x2a3   : > { %v2705_v35 = vpop.f32.mrb[5].mxu1  ;;  %2748 = vmatprep.subr.bf16.mxu0 %v3098_v29  ;;  %2812 = vmatprep.subr.bf16.mxu1 %v3100_v30 }
 0x2a4   : > { %v2706_v38 = vadd.f32 %v2705_v35, %v2704_v32  ;;  %v2707_v39 = vpop.f32.mrb[6].mxu1  ;;  %1287 = vmatmul.mubr.f32.gmra.mrb[34].mxu0 %v1093_v31  ;;  %1448 = vmatmul.mubr.f32.gmra.mrb[34].mxu1 %v1093_v31 }
 0x2a5   : > { %v2708_v40 = vpop.f32.mrb[7].mxu1  ;;  %1292 = vmatprep.mubr.f32.mxu0 %v3390_v0  ;;  %1453 = vmatprep.mubr.f32.mxu1 %v3390_v0 }
 0x2a6   : > { %v1098_v41 = vadd.f32 %v2706_v38, %v3835_v20  ;;  %v2709_v42 = vadd.f32 %v2708_v40, %v2707_v39  ;;  %2749 = vmatpush3.bf16.msra.mxu0 %v3099_v33  ;;  %2813 = vmatpush3.bf16.msra.mxu1 %v3101_v34 }
 0x2a7   : > { %2750 = vmatprep.subr.bf16.mxu0 %v3102_v36  ;;  %2814 = vmatprep.subr.bf16.mxu1 %v3104_v37 }
 0x2a8   : > { %1293 = vmatmul.mubr.f32.gmra.mrb[36].mxu0 %v1098_v41  ;;  %1454 = vmatmul.mubr.f32.gmra.mrb[36].mxu1 %v1098_v41  ;;  %v1101_v47 = vadd.f32 %v2709_v42, %v3835_v20 }
 0x2a9   : > { %1298 = vmatprep.mubr.f32.mxu0 %v3390_v0  ;;  %1459 = vmatprep.mubr.f32.mxu1 %v3390_v0 }
 0x2aa   : > { %v2710_v48 = vpop.f32.mrb[8].mxu1  ;;  %2751 = vmatpush3.bf16.msra.mxu0 %v3103_v43  ;;  %2815 = vmatpush3.bf16.msra.mxu1 %v3105_v44 }
 0x2ab   : > { %v2711_v51 = vpop.f32.mrb[9].mxu1  ;;  %2752 = vmatprep.subr.bf16.mxu0 %v3106_v45  ;;  %2816 = vmatprep.subr.bf16.mxu1 %v3108_v46 }
 0x2ac   : > { %v2712_v54 = vadd.f32 %v2711_v51, %v2710_v48  ;;  %v2713_v55 = vpop.f32.mrb[10].mxu1  ;;  %1299 = vmatmul.mubr.f32.gmra.mrb[38].mxu0 %v1101_v47  ;;  %1460 = vmatmul.mubr.f32.gmra.mrb[38].mxu1 %v1101_v47  ;;  %v3118_v47 = vld [vmem:[#allocation11 + $0x70] sm:$0xff]   ;;  %v3122_v51 = vld [vmem:[#allocation11 + $0x78] sm:$0xff]  }
 0x2ad   : > { %v2714_v56 = vpop.f32.mrb[11].mxu1  ;;  %1304 = vmatprep.mubr.f32.mxu0 %v3390_v0  ;;  %1465 = vmatprep.mubr.f32.mxu1 %v3390_v0  ;;  %v3120_v48 = vld [vmem:[#allocation11 + $0xf0] sm:$0xff]  }
 0x2ae   : > { %v1106_v57 = vadd.f32 %v2712_v54, %v3835_v20  ;;  %v2715_v58 = vadd.f32 %v2714_v56, %v2713_v55  ;;  %2753 = vmatpush3.bf16.msra.mxu0 %v3107_v49  ;;  %2817 = vmatpush3.bf16.msra.mxu1 %v3109_v50  ;;  %v3119_v49 = vld [vmem:[#allocation11 + $0x30] sm:$0xff]   ;;  %v3125_v54 = vld [vmem:[#allocation11 + $0xb8] sm:$0xff]   ;;  %v1554_v56 = vsub.s32 3, %v3744_v7 }
 0x2af   : > { %2754 = vmatprep.subr.bf16.mxu0 %v3110_v52  ;;  %2818 = vmatprep.subr.bf16.mxu1 %v3112_v53  ;;  %v3121_v50 = vld [vmem:[#allocation11 + $0xb0] sm:$0xff]   ;;  %v3124_v52 = vld [vmem:[#allocation11 + $0xf8] sm:$0xff]  }
 0x2b0   : > { %1305 = vmatmul.mubr.f32.gmra.mrb[40].mxu0 %v1106_v57  ;;  %1466 = vmatmul.mubr.f32.gmra.mrb[40].mxu1 %v1106_v57  ;;  %v1109_v63 = vadd.f32 %v2715_v58, %v3835_v20  ;;  %v3123_v53 = vld [vmem:[#allocation11 + $0x38] sm:$0xff]  }
 0x2b1   : > { %1310 = vmatprep.mubr.f32.mxu0 %v3390_v0  ;;  %1471 = vmatprep.mubr.f32.mxu1 %v3390_v0  ;;  %v1688_v55 = vld [vmem:[%s4474_s12] sm:$0xf]  ;;  %s3391_s12 = smov [#allocation13]  }
 0x2b2   : > { %v2716_v1 = vpop.f32.mrb[12].mxu1  ;;  %2755 = vmatpush3.bf16.msra.mxu0 %v3111_v59  ;;  %2819 = vmatpush3.bf16.msra.mxu1 %v3113_v60  ;;  %v3895_v58 = vrot.slane %v1688_v55, %v3747_v8  ;;  %s3300_s22 = sshll.u32 %s3391_s12, 4  ;;  %s3301_s22 = int_to_ptr.vmem [resolvable:$false] %s3300_s22 }
 0x2b3   : > { %v2717_v4 = vpop.f32.mrb[13].mxu1  ;;  %2756 = vmatprep.subr.bf16.mxu0 %v3114_v61  ;;  %2820 = vmatprep.subr.bf16.mxu1 %v3116_v62  ;;  %v3905_v62 = vrot.slane %v1688_v55, %v3753_v11  ;;  %s3302_s29 = scalar_lea.vmem %s3301_s22, 4096  ;;  %p3303_p3 = scmp.lt.s32.totalorder %s4388_s11, %s3301_s22 }
 0x2b4   : > { %v2718_v12 = vadd.f32 %v2717_v4, %v2716_v1  ;;  %v2719_v5 = vpop.f32.mrb[14].mxu1  ;;  %1311 = vmatmul.mubr.f32.gmra.mrb[42].mxu0 %v1109_v63  ;;  %1472 = vmatmul.mubr.f32.gmra.mrb[42].mxu1 %v1109_v63  ;;  %v3909_v1 = vrot.slane %v1688_v55, %v1554_v56  ;;  %p3304_p12 = scmp.lt.s32.totalorder %s3302_s29, %s3296_s23 }
 0x2b5   : > { %v2720_v13 = vpop.f32.mrb[15].mxu1  ;;  %1316 = vmatprep.mubr.f32.mxu0 %v3390_v0  ;;  %1477 = vmatprep.mubr.f32.mxu1 %v3390_v0 }
 0x2b6   : > { %v1114_v6 = vadd.f32 %v2718_v12, %v3835_v20  ;;  %v2721_v9 = vadd.f32 %v2720_v13, %v2719_v5  ;;  %2757 = vmatpush3.bf16.msra.mxu0 %v3115_v2  ;;  %2821 = vmatpush3.bf16.msra.mxu1 %v3117_v3  ;;  %p3305_p13 = por %p3304_p12, %p3303_p3 }
 0x2b7   : > { %2758 = vmatprep.subr.bf16.mxu0 %v3118_v47  ;;  %2822 = vmatprep.subr.bf16.mxu1 %v3120_v48 }
 0x2b8   : > { %1317 = vmatmul.mubr.f32.gmra.mrb[44].mxu0 %v1114_v6  ;;  %1478 = vmatmul.mubr.f32.gmra.mrb[44].mxu1 %v1114_v6  ;;  %v1117_v10 = vadd.f32 %v2721_v9, %v3835_v20  ;;  %p3306_p8 = pnand %p3305_p13, %p3299_p11 }
 0x2b9   : > { %1322 = vmatprep.mubr.f32.mxu0 %v3390_v0  ;;  %1483 = vmatprep.mubr.f32.mxu1 %v3390_v0 }
 0x2ba   : > { %v2722_v14 = vpop.f32.mrb[16].mxu1  ;;  %2759 = vmatpush3.bf16.msra.mxu0 %v3119_v49  ;;  %2823 = vmatpush3.bf16.msra.mxu1 %v3121_v50 }
 0x2bb   : > { %v2723_v15 = vpop.f32.mrb[17].mxu1  ;;  %2760 = vmatprep.subr.bf16.mxu0 %v3122_v51  ;;  %2824 = vmatprep.subr.bf16.mxu1 %v3124_v52 }
 0x2bc   : > { %v2724_v16 = vadd.f32 %v2723_v15, %v2722_v14  ;;  %v2725_v17 = vpop.f32.mrb[18].mxu1  ;;  %1323 = vmatmul.mubr.f32.gmra.mrb[46].mxu0 %v1117_v10  ;;  %1484 = vmatmul.mubr.f32.gmra.mrb[46].mxu1 %v1117_v10 }
 0x2bd   : > { %v2726_v18 = vpop.f32.mrb[19].mxu1  ;;  %1328 = vmatprep.mubr.f32.mxu0 %v3390_v0  ;;  %1489 = vmatprep.mubr.f32.mxu1 %v3390_v0 }
 0x2be   : > { %v1122_v19 = vadd.f32 %v2724_v16, %v3835_v20  ;;  %v2727_v21 = vadd.f32 %v2726_v18, %v2725_v17  ;;  %2761 = vmatpush3.bf16.msra.mxu0 %v3123_v53  ;;  %2825 = vmatpush3.bf16.msra.mxu1 %v3125_v54 }
 0x2c0   : > { %1329 = vmatmul.mubr.f32.gmra.mrb[48].mxu0 %v1122_v19  ;;  %1490 = vmatmul.mubr.f32.gmra.mrb[48].mxu1 %v1122_v19  ;;  %v1125_v22 = vadd.f32 %v2727_v21, %v3835_v20 }
 0x2c1   : > { %1334 = vmatprep.mubr.f32.mxu0 %v3390_v0  ;;  %1495 = vmatprep.mubr.f32.mxu1 %v3390_v0 }
 0x2c2   : > { %v2728_v23 = vpop.f32.mrb[20].mxu1 }
 0x2c3   : > { %v2729_v24 = vpop.f32.mrb[21].mxu1 }
 0x2c4   : > { %v2730_v25 = vadd.f32 %v2729_v24, %v2728_v23  ;;  %v2731_v26 = vpop.f32.mrb[22].mxu1  ;;  %1335 = vmatmul.mubr.f32.gmra.mrb[50].mxu0 %v1125_v22  ;;  %1496 = vmatmul.mubr.f32.gmra.mrb[50].mxu1 %v1125_v22 }
 0x2c5   : > { %v2732_v27 = vpop.f32.mrb[23].mxu1  ;;  %1340 = vmatprep.mubr.f32.mxu0 %v3390_v0  ;;  %1501 = vmatprep.mubr.f32.mxu1 %v3390_v0 }
 0x2c6   : > { %v1130_v28 = vadd.f32 %v2730_v25, %v3835_v20  ;;  %v2733_v29 = vadd.f32 %v2732_v27, %v2731_v26 }
 0x2c8   : > { %1341 = vmatmul.mubr.f32.gmra.mrb[52].mxu0 %v1130_v28  ;;  %1502 = vmatmul.mubr.f32.gmra.mrb[52].mxu1 %v1130_v28  ;;  %v1133_v30 = vadd.f32 %v2733_v29, %v3835_v20 }
 0x2c9   : > { %1346 = vmatprep.mubr.f32.mxu0 %v3390_v0  ;;  %1507 = vmatprep.mubr.f32.mxu1 %v3390_v0 }
 0x2ca   : > { %v2734_v31 = vpop.f32.mrb[24].mxu1 }
 0x2cb   : > { %v2735_v32 = vpop.f32.mrb[25].mxu1 }
 0x2cc   : > { %v2736_v33 = vadd.f32 %v2735_v32, %v2734_v31  ;;  %v2737_v34 = vpop.f32.mrb[26].mxu1  ;;  %1347 = vmatmul.mubr.f32.gmra.mrb[54].mxu0 %v1133_v30  ;;  %1508 = vmatmul.mubr.f32.gmra.mrb[54].mxu1 %v1133_v30 }
 0x2cd   : > { %v2738_v35 = vpop.f32.mrb[27].mxu1  ;;  %1352 = vmatprep.mubr.f32.mxu0 %v3390_v0  ;;  %1513 = vmatprep.mubr.f32.mxu1 %v3390_v0 }
 0x2ce   : > { %v1138_v36 = vadd.f32 %v2736_v33, %v3835_v20  ;;  %v2739_v37 = vadd.f32 %v2738_v35, %v2737_v34 }
 0x2d0   : > { %1353 = vmatmul.mubr.f32.gmra.mrb[56].mxu0 %v1138_v36  ;;  %1514 = vmatmul.mubr.f32.gmra.mrb[56].mxu1 %v1138_v36  ;;  %v1141_v38 = vadd.f32 %v2739_v37, %v3835_v20 }
 0x2d1   : > { %1358 = vmatprep.mubr.f32.mxu0 %v3390_v0  ;;  %1519 = vmatprep.mubr.f32.mxu1 %v3390_v0 }
 0x2d2   : > { %v2740_v39 = vpop.f32.mrb[28].mxu1 }
 0x2d3   : > { %v2741_v40 = vpop.f32.mrb[29].mxu1 }
 0x2d4   : > { %v2742_v41 = vadd.f32 %v2741_v40, %v2740_v39  ;;  %v2743_v42 = vpop.f32.mrb[30].mxu1  ;;  %1359 = vmatmul.mubr.f32.gmra.mrb[58].mxu0 %v1141_v38  ;;  %1520 = vmatmul.mubr.f32.gmra.mrb[58].mxu1 %v1141_v38 }
 0x2d5   : > { %v2744_v43 = vpop.f32.mrb[31].mxu1  ;;  %1364 = vmatprep.mubr.f32.mxu0 %v3390_v0  ;;  %1525 = vmatprep.mubr.f32.mxu1 %v3390_v0 }
 0x2d6   : > { %v1146_v44 = vadd.f32 %v2742_v41, %v3835_v20  ;;  %v2745_v45 = vadd.f32 %v2744_v43, %v2743_v42 }
 0x2d8   : > { %1365 = vmatmul.mubr.f32.gmra.mrb[60].mxu0 %v1146_v44  ;;  %1526 = vmatmul.mubr.f32.gmra.mrb[60].mxu1 %v1146_v44  ;;  %v1149_v46 = vadd.f32 %v2745_v45, %v3835_v20  ;;  %v1538_v20 = vld [vmem:[%s4441_s7] sm:$0xf] }
 0x2d9   : > { %1370 = vmatprep.mubr.f32.mxu0 %v3390_v0  ;;  %1531 = vmatprep.mubr.f32.mxu1 %v3390_v0  ;;  %v1550_v0 = vsub.s32 2, %v3744_v7  ;;  %v3892_v57 = vrot.slane %v1538_v20, %v3747_v8  ;;  %v3902_v61 = vrot.slane %v1538_v20, %v3753_v11  ;;  %v3907_v63 = vrot.slane %v1538_v20, %v1554_v56 }
 0x2db   : > { %v3897_v59 = vrot.slane %v1538_v20, %v1550_v0  ;;  %v3899_v60 = vrot.slane %v1688_v55, %v1550_v0 }
 0x2dc   : > { %1371 = vmatmul.mubr.f32.gmra.mrb[62].mxu0 %v1149_v46  ;;  %1532 = vmatmul.mubr.f32.gmra.mrb[62].mxu1 %v1149_v46 }
 0x373   : > { %v1282_v7 = vpop.f32.mrb[32].mxu0  ;;  %v1443_v2 = vpop.f32.mrb[32].mxu1 }
 0x374   : > { %v1560_v3 = vsub.f32 %v1282_v7, %v3892_v57  ;;  %v1710_v8 = vsub.f32 %v3895_v58, %v1282_v7  ;;  %v1562_v4 = vsub.f32 %v1443_v2, %v3897_v59  ;;  %v1712_v12 = vsub.f32 %v3899_v60, %v1443_v2  ;;  %v1284_v5 = vpop.f32.mrb[33].mxu0  ;;  %v1445_v13 = vpop.f32.mrb[33].mxu1 }
 0x375   : > { %v1561_v6 = vsub.f32 %v1284_v5, %v3902_v61  ;;  %v1711_v11 = vsub.f32 %v3905_v62, %v1284_v5  ;;  %v1563_v9 = vsub.f32 %v1445_v13, %v3907_v63  ;;  %v1713_v10 = vsub.f32 %v3909_v1, %v1445_v13 }
 0x376   : > { %v1624_v14 = vmax.f32 %v1560_v3, 0.0  ;;  %v1774_v15 = vmax.f32 %v1710_v8, 0.0  ;;  %v1626_v16 = vmax.f32 %v1562_v4, 0.0  ;;  %v1776_v17 = vmax.f32 %v1712_v12, 0.0 }
 0x377   : > { %v1625_v18 = vmax.f32 %v1561_v6, 0.0  ;;  %v1775_v19 = vmax.f32 %v1711_v11, 0.0  ;;  %v1627_v21 = vmax.f32 %v1563_v9, 0.0  ;;  %v1777_v22 = vmax.f32 %v1713_v10, 0.0  ;;  %v1288_v23 = vpop.f32.mrb[34].mxu0  ;;  %v1449_v24 = vpop.f32.mrb[34].mxu1 }
 0x378   : > { %v1838_v25 = vmul.f32 %v1774_v15, %v1624_v14  ;;  %v1840_v26 = vmul.f32 %v1776_v17, %v1626_v16  ;;  %v1564_v27 = vsub.f32 %v1288_v23, %v3892_v57  ;;  %v1714_v28 = vsub.f32 %v3895_v58, %v1288_v23  ;;  %v1290_v29 = vpop.f32.mrb[35].mxu0  ;;  %v1451_v30 = vpop.f32.mrb[35].mxu1 }
 0x379   : > { %v1566_v31 = vsub.f32 %v1449_v24, %v3897_v59  ;;  %v1716_v32 = vsub.f32 %v3899_v60, %v1449_v24  ;;  %v1839_v33 = vmul.f32 %v1775_v19, %v1625_v18  ;;  %v1841_v34 = vmul.f32 %v1777_v22, %v1627_v21 }
 0x37a   : > { %v1628_v35 = vmax.f32 %v1564_v27, 0.0  ;;  %v1778_v36 = vmax.f32 %v1714_v28, 0.0  ;;  %v3923_v37 = vmul.f32 %v1838_v25, %v1838_v25  ;;  %v3925_v38 = vmul.f32 %v1840_v26, %v1840_v26 }
 0x37b   : > { %v1630_v39 = vmax.f32 %v1566_v31, 0.0  ;;  %v1780_v40 = vmax.f32 %v1716_v32, 0.0  ;;  %v1294_v41 = vpop.f32.mrb[36].mxu0  ;;  %v1455_v42 = vpop.f32.mrb[36].mxu1  ;;  %v1565_v44 = vsub.f32 %v1290_v29, %v3902_v61  ;;  %v1715_v45 = vsub.f32 %v3905_v62, %v1290_v29 }
 0x37c   : > { %v1842_v43 = vmul.f32 %v1778_v36, %v1628_v35  ;;  %v1567_v46 = vsub.f32 %v1451_v30, %v3907_v63  ;;  %v1296_v47 = vpop.f32.mrb[37].mxu0  ;;  %v1457_v48 = vpop.f32.mrb[37].mxu1  ;;  %v1717_v50 = vsub.f32 %v3909_v1, %v1451_v30  ;;  %v1568_v51 = vsub.f32 %v1294_v41, %v3892_v57 }
 0x37d   : > { %v1844_v49 = vmul.f32 %v1780_v40, %v1630_v39  ;;  %v1718_v52 = vsub.f32 %v3895_v58, %v1294_v41  ;;  %v1629_v54 = vmax.f32 %v1565_v44, 0.0  ;;  %v1779_v0 = vmax.f32 %v1715_v45, 0.0 }
 0x37e   : > { %v3933_v53 = vmul.f32 %v1842_v43, %v1842_v43  ;;  %v1631_v20 = vmax.f32 %v1567_v46, 0.0  ;;  %v1781_v56 = vmax.f32 %v1717_v50, 0.0  ;;  %v1632_v7 = vmax.f32 %v1568_v51, 0.0 }
 0x37f   : > { %v3935_v55 = vmul.f32 %v1844_v49, %v1844_v49  ;;  %v1782_v2 = vmax.f32 %v1718_v52, 0.0  ;;  %v1300_v3 = vpop.f32.mrb[38].mxu0  ;;  %v1461_v8 = vpop.f32.mrb[38].mxu1  ;;  %v1570_v12 = vsub.f32 %v1455_v42, %v3897_v59  ;;  %v1720_v5 = vsub.f32 %v3899_v60, %v1455_v42 }
 0x380   : > { %v1966_v4 = vpack.c.bf16 %v3933_v53, %v3923_v37  ;;  %v1302_v13 = vpop.f32.mrb[39].mxu0  ;;  %v1463_v6 = vpop.f32.mrb[39].mxu1  ;;  %v3941_v11 = vmul.f32 %v1839_v33, %v1839_v33  ;;  %v3943_v9 = vmul.f32 %v1841_v34, %v1841_v34  ;;  %v1569_v14 = vsub.f32 %v1296_v47, %v3902_v61 }
 0x381   : > { %v1968_v10 = vpack.c.bf16 %v3935_v55, %v3925_v38  ;;  %v1843_v15 = vmul.f32 %v1779_v0, %v1629_v54  ;;  %v1634_v16 = vmax.f32 %v1570_v12, 0.0  ;;  %v1784_v17 = vmax.f32 %v1720_v5, 0.0 }
 0x382   : > { %v1719_v18 = vsub.f32 %v3905_v62, %v1296_v47  ;;  %v1845_v19 = vmul.f32 %v1781_v56, %v1631_v20  ;;  %v1846_v21 = vmul.f32 %v1782_v2, %v1632_v7  ;;  %v1633_v22 = vmax.f32 %v1569_v14, 0.0 }
 0x383   : > { %v1571_v23 = vsub.f32 %v1457_v48, %v3907_v63  ;;  %v1306_v24 = vpop.f32.mrb[40].mxu0  ;;  %v1467_v25 = vpop.f32.mrb[40].mxu1  ;;  %v1848_v26 = vmul.f32 %v1784_v17, %v1634_v16  ;;  %v1721_v28 = vsub.f32 %v3909_v1, %v1457_v48  ;;  %v1572_v29 = vsub.f32 %v1300_v3, %v3892_v57 }
 0x384   : > { %v1783_v27 = vmax.f32 %v1719_v18, 0.0  ;;  %v3952_v30 = vpop.f32.mrb[41].mxu0  ;;  %v3954_v31 = vpop.f32.mrb[41].mxu1  ;;  %v1722_v33 = vsub.f32 %v3895_v58, %v1300_v3  ;;  %v1574_v34 = vsub.f32 %v1461_v8, %v3897_v59  ;;  %v1724_v35 = vsub.f32 %v3899_v60, %v1461_v8 }
 0x385   : > { %v1635_v32 = vmax.f32 %v1571_v23, 0.0  ;;  %v1907_v36 = vmul.f32 %v1843_v15, %v1843_v15  ;;  %v1785_v40 = vmax.f32 %v1721_v28, 0.0  ;;  %v1636_v41 = vmax.f32 %v1572_v29, 0.0 }
 0x386   : > { %v1847_v39 = vmul.f32 %v1783_v27, %v1633_v22  ;;  %v1786_v42 = vmax.f32 %v1722_v33, 0.0  ;;  %v1638_v43 = vmax.f32 %v1574_v34, 0.0  ;;  %v1788_v44 = vmax.f32 %v1724_v35, 0.0 }
 0x387   : > { %v1573_v45 = vsub.f32 %v1302_v13, %v3902_v61  ;;  %v1312_v46 = vpop.f32.mrb[42].mxu0  ;;  %v3960_v47 = vpop.f32.mrb[42].mxu1  ;;  %v1909_v48 = vmul.f32 %v1845_v19, %v1845_v19  ;;  %v1849_v49 = vmul.f32 %v1785_v40, %v1635_v32  ;;  %v1723_v50 = vsub.f32 %v3905_v62, %v1302_v13 }
 0x388   : > { %v1575_v51 = vsub.f32 %v1463_v6, %v3907_v63  ;;  %v3964_v52 = vpop.f32.mrb[43].mxu0  ;;  %v3966_v54 = vpop.f32.mrb[43].mxu1  ;;  %v3968_v0 = vmul.f32 %v1846_v21, %v1846_v21  ;;  %v3970_v20 = vmul.f32 %v1848_v26, %v1848_v26  ;;  %v1725_v7 = vsub.f32 %v3909_v1, %v1463_v6 }
 0x389   : > { %v1637_v56 = vmax.f32 %v1573_v45, 0.0  ;;  %v3973_v2 = vmul.f32 %v1847_v39, %v1847_v39  ;;  %v1850_v3 = vmul.f32 %v1786_v42, %v1636_v41  ;;  %v1787_v8 = vmax.f32 %v1723_v50, 0.0 }
 0x38a   : > { %v1576_v12 = vsub.f32 %v1306_v24, %v3892_v57  ;;  %v1852_v5 = vmul.f32 %v1788_v44, %v1638_v43  ;;  %v1639_v13 = vmax.f32 %v1575_v51, 0.0  ;;  %v1789_v14 = vmax.f32 %v1725_v7, 0.0 }
 0x38b   : > { %v1726_v15 = vsub.f32 %v3895_v58, %v1306_v24  ;;  %v3977_v16 = vpop.f32.mrb[44].mxu0  ;;  %v3979_v17 = vpop.f32.mrb[44].mxu1  ;;  %v3981_v18 = vmul.f32 %v1849_v49, %v1849_v49  ;;  %v1851_v19 = vmul.f32 %v1787_v8, %v1637_v56  ;;  %v1578_v6 = vsub.f32 %v1467_v25, %v3897_v59 }
 0x38c   : > { %v1728_v21 = vsub.f32 %v3899_v60, %v1467_v25  ;;  %v3985_v22 = vpop.f32.mrb[45].mxu0  ;;  %v3987_v23 = vpop.f32.mrb[45].mxu1  ;;  %v1640_v26 = vmax.f32 %v1576_v12, 0.0  ;;  %v1967_v28 = vpack.c.bf16 %v1907_v36, %v3941_v11  ;;  %v1969_v24 = vpack.c.bf16 %v1909_v48, %v3943_v9 }
 0x38d   : > { %v1790_v27 = vmax.f32 %v1726_v15, 0.0  ;;  %v3991_v29 = vmul.f32 %v1850_v3, %v1850_v3  ;;  %v1642_v32 = vmax.f32 %v1578_v6, 0.0  ;;  %v1577_v34 = vsub.f32 %v3952_v30, %v3902_v61 }
 0x38e   : > { %v1792_v33 = vmax.f32 %v1728_v21, 0.0  ;;  %v3995_v35 = vmul.f32 %v1852_v5, %v1852_v5  ;;  %v1853_v25 = vmul.f32 %v1789_v14, %v1639_v13  ;;  %2293 = vmatprep.mubr.bf16.mxu0 %v1967_v28  ;;  %2390 = vmatprep.mubr.bf16.mxu1 %v1969_v24  ;;  %v1727_v39 = vsub.f32 %v3905_v62, %v3952_v30 }
 0x38f   : > { %v3999_v40 = vpop.f32.mrb[46].mxu0  ;;  %v4001_v11 = vpop.f32.mrb[46].mxu1  ;;  %v1915_v9 = vmul.f32 %v1851_v19, %v1851_v19  ;;  %v1641_v36 = vmax.f32 %v1577_v34, 0.0  ;;  %v1579_v41 = vsub.f32 %v3954_v31, %v3907_v63  ;;  %v1729_v42 = vsub.f32 %v3909_v1, %v3954_v31  ;;  %2294 = vmatmul.mubr.bf16.vlgmr.msra.gmra.mrb[64].mxu0 %v1966_v4  ;;  %2391 = vmatmul.mubr.bf16.vlgmr.msra.gmra.mrb[64].mxu1 %v1968_v10 }
 0x390   : > { %v4013_v30 = vpop.f32.mrb[47].mxu0  ;;  %v4015_v43 = vpop.f32.mrb[47].mxu1  ;;  %v1854_v44 = vmul.f32 %v1790_v27, %v1640_v26  ;;  %v1791_v45 = vmax.f32 %v1727_v39, 0.0  ;;  %v1580_v48 = vsub.f32 %v1312_v46, %v3892_v57  ;;  %v1730_v49 = vsub.f32 %v3895_v58, %v1312_v46 }
 0x391   : > { %v1856_v50 = vmul.f32 %v1792_v33, %v1642_v32  ;;  %v1643_v31 = vmax.f32 %v1579_v41, 0.0  ;;  %v1793_v51 = vmax.f32 %v1729_v42, 0.0  ;;  %v1582_v37 = vsub.f32 %v3960_v47, %v3897_v59 }
 0x392   : > { %v1855_v53 = vmul.f32 %v1791_v45, %v1641_v36  ;;  %v1644_v4 = vmax.f32 %v1580_v48, 0.0  ;;  %v1794_v38 = vmax.f32 %v1730_v49, 0.0  ;;  %v1732_v55 = vsub.f32 %v3899_v60, %v3960_v47 }
 0x393   : > { %v4023_v10 = vpop.f32.mrb[48].mxu0  ;;  %v4025_v56 = vpop.f32.mrb[48].mxu1  ;;  %v1917_v7 = vmul.f32 %v1853_v25, %v1853_v25  ;;  %v1646_v3 = vmax.f32 %v1582_v37, 0.0  ;;  %v1581_v46 = vsub.f32 %v3964_v52, %v3902_v61  ;;  %v1731_v8 = vsub.f32 %v3905_v62, %v3964_v52 }
 0x394   : > { %v4031_v12 = vpop.f32.mrb[49].mxu0  ;;  %v4033_v5 = vpop.f32.mrb[49].mxu1  ;;  %v4035_v13 = vmul.f32 %v1854_v44, %v1854_v44  ;;  %v1857_v14 = vmul.f32 %v1793_v51, %v1643_v31  ;;  %v1796_v47 = vmax.f32 %v1732_v55, 0.0  ;;  %v1583_v15 = vsub.f32 %v3966_v54, %v3907_v63 }
 0x395   : > { %v4039_v19 = vmul.f32 %v1856_v50, %v1856_v50  ;;  %v1645_v6 = vmax.f32 %v1581_v46, 0.0  ;;  %v1795_v21 = vmax.f32 %v1731_v8, 0.0  ;;  %v1733_v26 = vsub.f32 %v3909_v1, %v3966_v54 }
 0x396   : > { %v4043_v27 = vmul.f32 %v1855_v53, %v1855_v53  ;;  %v1858_v52 = vmul.f32 %v1794_v38, %v1644_v4  ;;  %v1647_v28 = vmax.f32 %v1583_v15, 0.0  ;;  %v1584_v24 = vsub.f32 %v3977_v16, %v3892_v57 }
 0x397   : > { %v4047_v32 = vpop.f32.mrb[50].mxu0  ;;  %v4049_v33 = vpop.f32.mrb[50].mxu1  ;;  %v1860_v34 = vmul.f32 %v1796_v47, %v1646_v3  ;;  %v1797_v25 = vmax.f32 %v1733_v26, 0.0  ;;  %v1734_v39 = vsub.f32 %v3895_v58, %v3977_v16  ;;  %v1586_v36 = vsub.f32 %v3979_v17, %v3897_v59 }
 0x398   : > { %v4055_v54 = vpop.f32.mrb[51].mxu0  ;;  %v4057_v41 = vpop.f32.mrb[51].mxu1  ;;  %v4059_v42 = vmul.f32 %v1857_v14, %v1857_v14  ;;  %v1859_v44 = vmul.f32 %v1795_v21, %v1645_v6  ;;  %v1736_v45 = vsub.f32 %v3899_v60, %v3979_v17  ;;  %v1971_v48 = vpack.c.bf16 %v1915_v9, %v3973_v2 }
 0x399   : > { %v1861_v49 = vmul.f32 %v1797_v25, %v1647_v28  ;;  %v1648_v50 = vmax.f32 %v1584_v24, 0.0  ;;  %v1798_v31 = vmax.f32 %v1734_v39, 0.0  ;;  %v1650_v51 = vmax.f32 %v1586_v36, 0.0 }
 0x39a   : > { %v1800_v16 = vmax.f32 %v1736_v45, 0.0  ;;  %2301 = vmatprep.mubr.bf16.mxu0 %v1971_v48  ;;  %v1973_v37 = vpack.c.bf16 %v1917_v7, %v3981_v18  ;;  %v1585_v53 = vsub.f32 %v3985_v22, %v3902_v61  ;;  %v1735_v4 = vsub.f32 %v3905_v62, %v3985_v22 }
 0x39b   : > { %v4069_v38 = vpop.f32.mrb[52].mxu0  ;;  %v4071_v55 = vpop.f32.mrb[52].mxu1  ;;  %v4073_v17 = vmul.f32 %v1858_v52, %v1858_v52  ;;  %v4075_v2 = vmul.f32 %v1860_v34, %v1860_v34  ;;  %v1587_v9 = vsub.f32 %v3987_v23, %v3907_v63  ;;  %v1737_v18 = vsub.f32 %v3909_v1, %v3987_v23 }
 0x39c   : > { %v4081_v7 = vpop.f32.mrb[53].mxu0  ;;  %v4083_v3 = vpop.f32.mrb[53].mxu1  ;;  %v4085_v46 = vmul.f32 %v1859_v44, %v1859_v44  ;;  %2398 = vmatprep.mubr.bf16.mxu1 %v1973_v37  ;;  %v1649_v22 = vmax.f32 %v1585_v53, 0.0  ;;  %v1799_v8 = vmax.f32 %v1735_v4, 0.0  ;;  %v1970_v14 = vpack.c.bf16 %v3991_v29, %v3968_v0 }
 0x39d   : > { %v1862_v47 = vmul.f32 %v1798_v31, %v1648_v50  ;;  %v1651_v15 = vmax.f32 %v1587_v9, 0.0  ;;  %v1801_v6 = vmax.f32 %v1737_v18, 0.0  ;;  %v1972_v21 = vpack.c.bf16 %v3995_v35, %v3970_v20 }
 0x39e   : > { %v1925_v26 = vmul.f32 %v1861_v49, %v1861_v49  ;;  %v1864_v23 = vmul.f32 %v1800_v16, %v1650_v51  ;;  %2302 = vmatmul.mubr.bf16.gmra.mrb[68].mxu0 %v1970_v14  ;;  %v1588_v52 = vsub.f32 %v3999_v40, %v3892_v57  ;;  %v1738_v28 = vsub.f32 %v3895_v58, %v3999_v40 }
 0x39f   : > { %v4095_v24 = vpop.f32.mrb[54].mxu0  ;;  %v4097_v34 = vpop.f32.mrb[54].mxu1  ;;  %v1863_v0 = vmul.f32 %v1799_v8, %v1649_v22  ;;  %2399 = vmatmul.mubr.bf16.gmra.mrb[68].mxu1 %v1972_v21  ;;  %v1590_v29 = vsub.f32 %v4001_v11, %v3897_v59  ;;  %v1740_v20 = vsub.f32 %v3899_v60, %v4001_v11  ;;  %v1589_v35 = vsub.f32 %v4013_v30, %v3902_v61 }
 0x3a0   : > { %v4105_v25 = vpop.f32.mrb[55].mxu0  ;;  %v4107_v39 = vpop.f32.mrb[55].mxu1  ;;  %v1865_v40 = vmul.f32 %v1801_v6, %v1651_v15  ;;  %v1652_v36 = vmax.f32 %v1588_v52, 0.0  ;;  %v1802_v44 = vmax.f32 %v1738_v28, 0.0  ;;  %v1739_v45 = vsub.f32 %v3905_v62, %v4013_v30 }
 0x3a1   : > { %v4111_v48 = vmul.f32 %v1862_v47, %v1862_v47  ;;  %v1654_v49 = vmax.f32 %v1590_v29, 0.0  ;;  %v1804_v50 = vmax.f32 %v1740_v20, 0.0  ;;  %v1653_v31 = vmax.f32 %v1589_v35, 0.0 }
 0x3a2   : > { %v1866_v51 = vmul.f32 %v1802_v44, %v1652_v36  ;;  %v1803_v11 = vmax.f32 %v1739_v45, 0.0  ;;  %v1591_v16 = vsub.f32 %v4015_v43, %v3907_v63  ;;  %v1741_v37 = vsub.f32 %v3909_v1, %v4015_v43 }
 0x3a3   : > { %v4117_v53 = vpop.f32.mrb[56].mxu0  ;;  %v4119_v4 = vpop.f32.mrb[56].mxu1  ;;  %v4121_v9 = vmul.f32 %v1864_v23, %v1864_v23  ;;  %v1592_v30 = vsub.f32 %v4023_v10, %v3892_v57  ;;  %v1742_v18 = vsub.f32 %v3895_v58, %v4023_v10  ;;  %v1594_v22 = vsub.f32 %v4025_v56, %v3897_v59 }
 0x3a4   : > { %v4129_v8 = vpop.f32.mrb[57].mxu0  ;;  %v4131_v14 = vpop.f32.mrb[57].mxu1  ;;  %v4133_v43 = vmul.f32 %v1863_v0, %v1863_v0  ;;  %v4135_v47 = vmul.f32 %v1865_v40, %v1865_v40  ;;  %v1655_v15 = vmax.f32 %v1591_v16, 0.0  ;;  %v1805_v6 = vmax.f32 %v1741_v37, 0.0 }
 0x3a5   : > { %v4137_v21 = vmul.f32 %v1866_v51, %v1866_v51  ;;  %v1868_v23 = vmul.f32 %v1804_v50, %v1654_v49  ;;  %v1656_v52 = vmax.f32 %v1592_v30, 0.0  ;;  %v1806_v28 = vmax.f32 %v1742_v18, 0.0 }
 0x3a6   : > { %v1867_v29 = vmul.f32 %v1803_v11, %v1653_v31  ;;  %v1658_v10 = vmax.f32 %v1594_v22, 0.0  ;;  %v1744_v20 = vsub.f32 %v3899_v60, %v4025_v56  ;;  %v1975_v35 = vpack.c.bf16 %v4085_v46, %v4043_v27 }
 0x3a7   : > { %v4143_v36 = vpop.f32.mrb[58].mxu0  ;;  %v4145_v0 = vpop.f32.mrb[58].mxu1  ;;  %v1869_v40 = vmul.f32 %v1805_v6, %v1655_v15  ;;  %v1977_v44 = vpack.c.bf16 %v1925_v26, %v4059_v42  ;;  %v1593_v45 = vsub.f32 %v4031_v12, %v3902_v61  ;;  %v1743_v49 = vsub.f32 %v3905_v62, %v4031_v12 }
 0x3a8   : > { %v4152_v50 = vpop.f32.mrb[59].mxu0  ;;  %v4154_v31 = vpop.f32.mrb[59].mxu1  ;;  %v1870_v56 = vmul.f32 %v1806_v28, %v1656_v52  ;;  %v1808_v51 = vmax.f32 %v1744_v20, 0.0  ;;  %2309 = vmatprep.mubr.bf16.mxu0 %v1975_v35  ;;  %v1595_v27 = vsub.f32 %v4033_v5, %v3907_v63  ;;  %v1745_v46 = vsub.f32 %v3909_v1, %v4033_v5 }
 0x3a9   : > { %v4160_v42 = vmul.f32 %v1868_v23, %v1868_v23  ;;  %2406 = vmatprep.mubr.bf16.mxu1 %v1977_v44  ;;  %v1657_v26 = vmax.f32 %v1593_v45, 0.0  ;;  %v1807_v11 = vmax.f32 %v1743_v49, 0.0  ;;  %v1974_v12 = vpack.c.bf16 %v4073_v17, %v4035_v13 }
 0x3aa   : > { %v1931_v16 = vmul.f32 %v1867_v29, %v1867_v29  ;;  %v1659_v37 = vmax.f32 %v1595_v27, 0.0  ;;  %v1809_v30 = vmax.f32 %v1745_v46, 0.0  ;;  %v1976_v18 = vpack.c.bf16 %v4075_v2, %v4039_v19 }
 0x3ab   : > { %v4166_v22 = vpop.f32.mrb[60].mxu0  ;;  %v4168_v15 = vpop.f32.mrb[60].mxu1  ;;  %v1933_v6 = vmul.f32 %v1869_v40, %v1869_v40  ;;  %2310 = vmatmul.mubr.bf16.gmra.mrb[72].mxu0 %v1974_v12  ;;  %v1596_v5 = vsub.f32 %v4047_v32, %v3892_v57  ;;  %v1746_v23 = vsub.f32 %v3895_v58, %v4047_v32  ;;  %v1598_v13 = vsub.f32 %v4049_v33, %v3897_v59 }
 0x3ac   : > { %v4176_v17 = vpop.f32.mrb[61].mxu0  ;;  %v4178_v52 = vpop.f32.mrb[61].mxu1  ;;  %v4180_v19 = vmul.f32 %v1870_v56, %v1870_v56  ;;  %v1872_v2 = vmul.f32 %v1808_v51, %v1658_v10  ;;  %2407 = vmatmul.mubr.bf16.gmra.mrb[72].mxu1 %v1976_v18  ;;  %v1748_v28 = vsub.f32 %v3899_v60, %v4049_v33  ;;  %v1597_v29 = vsub.f32 %v4055_v54, %v3902_v61 }
 0x3ad   : > { %v1871_v20 = vmul.f32 %v1807_v11, %v1657_v26  ;;  %v1873_v35 = vmul.f32 %v1809_v30, %v1659_v37  ;;  %v1660_v32 = vmax.f32 %v1596_v5, 0.0  ;;  %v1810_v40 = vmax.f32 %v1746_v23, 0.0 }
 0x3ae   : > { %v1662_v44 = vmax.f32 %v1598_v13, 0.0  ;;  %v1812_v45 = vmax.f32 %v1748_v28, 0.0  ;;  %v1661_v49 = vmax.f32 %v1597_v29, 0.0  ;;  %v1747_v27 = vsub.f32 %v3905_v62, %v4055_v54 }
 0x3af   : > { %v4188_v56 = vpop.f32.mrb[62].mxu0  ;;  %v4190_v10 = vpop.f32.mrb[62].mxu1  ;;  %v1874_v51 = vmul.f32 %v1810_v40, %v1660_v32  ;;  %v1599_v33 = vsub.f32 %v4057_v41, %v3907_v63  ;;  %v1749_v46 = vsub.f32 %v3909_v1, %v4057_v41  ;;  %v1600_v26 = vsub.f32 %v4069_v38, %v3892_v57 }
 0x3b0   : > { %v4198_v11 = vpop.f32.mrb[63].mxu0  ;;  %v4200_v12 = vpop.f32.mrb[63].mxu1  ;;  %v4202_v37 = vmul.f32 %v1872_v2, %v1872_v2  ;;  %v1811_v54 = vmax.f32 %v1747_v27, 0.0  ;;  %v1750_v30 = vsub.f32 %v3895_v58, %v4069_v38  ;;  %v1602_v18 = vsub.f32 %v4071_v55, %v3897_v59 }
 0x3b1   : > { %4475 = vst [vmem:[#allocation19_spill] sm:$0xff] %v4198_v11  ;;  %4476 = vst [vmem:[#allocation20_spill] sm:$0xff] %v4200_v12  ;;  %v4208_v5 = vmul.f32 %v1871_v20, %v1871_v20  ;;  %v1663_v23 = vmax.f32 %v1599_v33, 0.0  ;;  %v1813_v41 = vmax.f32 %v1749_v46, 0.0  ;;  %v1664_v13 = vmax.f32 %v1600_v26, 0.0 }
 0x3b2   : > { %v4210_v28 = vmul.f32 %v1873_v35, %v1873_v35  ;;  %v4212_v29 = vmul.f32 %v1874_v51, %v1874_v51  ;;  %v1876_v32 = vmul.f32 %v1812_v45, %v1662_v44  ;;  %v1814_v40 = vmax.f32 %v1750_v30, 0.0 }
 0x3b3   : > { %v1875_v2 = vmul.f32 %v1811_v54, %v1661_v49  ;;  %v1752_v27 = vsub.f32 %v3899_v60, %v4071_v55  ;;  %v1979_v38 = vpack.c.bf16 %v1931_v16, %v4133_v43  ;;  %v1981_v12 = vpack.c.bf16 %v1933_v6, %v4135_v47 }
 0x3b4   : > { %v1877_v11 = vmul.f32 %v1813_v41, %v1663_v23  ;;  %v1666_v20 = vmax.f32 %v1602_v18, 0.0  ;;  %v1601_v33 = vsub.f32 %v4081_v7, %v3902_v61  ;;  %v1751_v35 = vsub.f32 %v3905_v62, %v4081_v7 }
 0x3b5   : > { %v1878_v51 = vmul.f32 %v1814_v40, %v1664_v13  ;;  %v1816_v46 = vmax.f32 %v1752_v27, 0.0  ;;  %2317 = vmatprep.mubr.bf16.mxu0 %v1979_v38  ;;  %2414 = vmatprep.mubr.bf16.mxu1 %v1981_v12  ;;  %v1603_v44 = vsub.f32 %v4083_v3, %v3907_v63  ;;  %v1753_v55 = vsub.f32 %v3909_v1, %v4083_v3 }
 0x3b6   : > { %v4226_v43 = vmul.f32 %v1876_v32, %v1876_v32  ;;  %v1665_v47 = vmax.f32 %v1601_v33, 0.0  ;;  %v1815_v16 = vmax.f32 %v1751_v35, 0.0  ;;  %v1978_v6 = vpack.c.bf16 %v4137_v21, %v4111_v48 }
 0x3b7   : > { %v1939_v45 = vmul.f32 %v1875_v2, %v1875_v2  ;;  %v1667_v49 = vmax.f32 %v1603_v44, 0.0  ;;  %v1817_v7 = vmax.f32 %v1753_v55, 0.0  ;;  %v1980_v26 = vpack.c.bf16 %v4160_v42, %v4121_v9 }
 0x3b8   : > { %v1941_v12 = vmul.f32 %v1877_v11, %v1877_v11  ;;  %2318 = vmatmul.mubr.bf16.gmra.mrb[76].mxu0 %v1978_v6  ;;  %v1604_v54 = vsub.f32 %v4095_v24, %v3892_v57  ;;  %v1754_v3 = vsub.f32 %v3895_v58, %v4095_v24  ;;  %v1606_v30 = vsub.f32 %v4097_v34, %v3897_v59 }
 0x3b9   : > { %v4238_v18 = vmul.f32 %v1878_v51, %v1878_v51  ;;  %v1880_v48 = vmul.f32 %v1816_v46, %v1666_v20  ;;  %2415 = vmatmul.mubr.bf16.gmra.mrb[76].mxu1 %v1980_v26  ;;  %v1756_v21 = vsub.f32 %v3899_v60, %v4097_v34  ;;  %v1605_v9 = vsub.f32 %v4105_v25, %v3902_v61 }
 0x3ba   : > { %v1879_v42 = vmul.f32 %v1815_v16, %v1665_v47  ;;  %v1881_v11 = vmul.f32 %v1817_v7, %v1667_v49  ;;  %v1668_v23 = vmax.f32 %v1604_v54, 0.0  ;;  %v1818_v41 = vmax.f32 %v1754_v3, 0.0 }
 0x3bb   : > { %v1670_v13 = vmax.f32 %v1606_v30, 0.0  ;;  %v1820_v32 = vmax.f32 %v1756_v21, 0.0  ;;  %v1669_v24 = vmax.f32 %v1605_v9, 0.0  ;;  %v1755_v40 = vsub.f32 %v3905_v62, %v4105_v25 }
 0x3bc   : > { %v1882_v2 = vmul.f32 %v1818_v41, %v1668_v23  ;;  %v1607_v27 = vsub.f32 %v4107_v39, %v3907_v63  ;;  %v1757_v34 = vsub.f32 %v3909_v1, %v4107_v39  ;;  %v1608_v38 = vsub.f32 %v4117_v53, %v3892_v57 }
 0x3bd   : > { %v4252_v20 = vmul.f32 %v1880_v48, %v1880_v48  ;;  %v1819_v33 = vmax.f32 %v1755_v40, 0.0  ;;  %v1758_v35 = vsub.f32 %v3895_v58, %v4117_v53  ;;  %v1610_v51 = vsub.f32 %v4119_v4, %v3897_v59 }
 0x3be   : > { %v4258_v25 = vmul.f32 %v1879_v42, %v1879_v42  ;;  %v1671_v46 = vmax.f32 %v1607_v27, 0.0  ;;  %v1821_v44 = vmax.f32 %v1757_v34, 0.0  ;;  %v1672_v55 = vmax.f32 %v1608_v38, 0.0 }
 0x3bf   : > { %v4260_v47 = vmul.f32 %v1881_v11, %v1881_v11  ;;  %v4262_v39 = vmul.f32 %v1882_v2, %v1882_v2  ;;  %v1884_v16 = vmul.f32 %v1820_v32, %v1670_v13  ;;  %v1822_v6 = vmax.f32 %v1758_v35, 0.0 }
 0x3c0   : > { %v1883_v49 = vmul.f32 %v1819_v33, %v1669_v24  ;;  %v1760_v7 = vsub.f32 %v3899_v60, %v4119_v4  ;;  %v1983_v53 = vpack.c.bf16 %v1939_v45, %v4208_v5  ;;  %v1985_v26 = vpack.c.bf16 %v1941_v12, %v4210_v28 }
 0x3c1   : > { %v1885_v54 = vmul.f32 %v1821_v44, %v1671_v46  ;;  %v1674_v3 = vmax.f32 %v1610_v51, 0.0  ;;  %v1609_v30 = vsub.f32 %v4129_v8, %v3902_v61  ;;  %v1759_v48 = vsub.f32 %v3905_v62, %v4129_v8 }
 0x3c2   : > { %v1886_v21 = vmul.f32 %v1822_v6, %v1672_v55  ;;  %v1824_v9 = vmax.f32 %v1760_v7, 0.0  ;;  %2325 = vmatprep.mubr.bf16.mxu0 %v1983_v53  ;;  %2422 = vmatprep.mubr.bf16.mxu1 %v1985_v26  ;;  %v1611_v42 = vsub.f32 %v4131_v14, %v3907_v63  ;;  %v1761_v4 = vsub.f32 %v3909_v1, %v4131_v14 }
 0x3c3   : > { %v4276_v5 = vmul.f32 %v1884_v16, %v1884_v16  ;;  %v1673_v28 = vmax.f32 %v1609_v30, 0.0  ;;  %v1823_v45 = vmax.f32 %v1759_v48, 0.0  ;;  %v1982_v12 = vpack.c.bf16 %v4212_v29, %v4180_v19 }
 0x3c4   : > { %v1947_v11 = vmul.f32 %v1883_v49, %v1883_v49  ;;  %v1675_v23 = vmax.f32 %v1611_v42, 0.0  ;;  %v1825_v8 = vmax.f32 %v1761_v4, 0.0  ;;  %v1984_v41 = vpack.c.bf16 %v4226_v43, %v4202_v37 }
 0x3c5   : > { %v1949_v13 = vmul.f32 %v1885_v54, %v1885_v54  ;;  %2326 = vmatmul.mubr.bf16.gmra.mrb[80].mxu0 %v1982_v12  ;;  %v1612_v32 = vsub.f32 %v4143_v36, %v3892_v57  ;;  %v1762_v14 = vsub.f32 %v3895_v58, %v4143_v36  ;;  %v1614_v24 = vsub.f32 %v4145_v0, %v3897_v59 }
 0x3c6   : > { %v4288_v40 = vmul.f32 %v1886_v21, %v1886_v21  ;;  %v1888_v19 = vmul.f32 %v1824_v9, %v1674_v3  ;;  %2423 = vmatmul.mubr.bf16.gmra.mrb[80].mxu1 %v1984_v41  ;;  %v1764_v29 = vsub.f32 %v3899_v60, %v4145_v0  ;;  %v1613_v37 = vsub.f32 %v4152_v50, %v3902_v61 }
 0x3c7   : > { %v1887_v43 = vmul.f32 %v1823_v45, %v1673_v28  ;;  %v1889_v2 = vmul.f32 %v1825_v8, %v1675_v23  ;;  %v1676_v27 = vmax.f32 %v1612_v32, 0.0  ;;  %v1826_v34 = vmax.f32 %v1762_v14, 0.0 }
 0x3c8   : > { %v1678_v38 = vmax.f32 %v1614_v24, 0.0  ;;  %v1828_v33 = vmax.f32 %v1764_v29, 0.0  ;;  %v1677_v36 = vmax.f32 %v1613_v37, 0.0  ;;  %v1763_v35 = vsub.f32 %v3905_v62, %v4152_v50 }
 0x3c9   : > { %v1890_v51 = vmul.f32 %v1826_v34, %v1676_v27  ;;  %v1615_v46 = vsub.f32 %v4154_v31, %v3907_v63  ;;  %v1765_v0 = vsub.f32 %v3909_v1, %v4154_v31  ;;  %v1616_v44 = vsub.f32 %v4166_v22, %v3892_v57 }
 0x3ca   : > { %v4302_v55 = vmul.f32 %v1888_v19, %v1888_v19  ;;  %v1827_v16 = vmax.f32 %v1763_v35, 0.0  ;;  %v1766_v6 = vsub.f32 %v3895_v58, %v4166_v22  ;;  %v1618_v49 = vsub.f32 %v4168_v15, %v3897_v59 }
 0x3cb   : > { %v1951_v50 = vmul.f32 %v1887_v43, %v1887_v43  ;;  %v1679_v7 = vmax.f32 %v1615_v46, 0.0  ;;  %v1829_v53 = vmax.f32 %v1765_v0, 0.0  ;;  %v1680_v26 = vmax.f32 %v1616_v44, 0.0 }
 0x3cc   : > { %v1953_v54 = vmul.f32 %v1889_v2, %v1889_v2  ;;  %v1954_v3 = vmul.f32 %v1890_v51, %v1890_v51  ;;  %v1892_v30 = vmul.f32 %v1828_v33, %v1678_v38  ;;  %v1830_v31 = vmax.f32 %v1766_v6, 0.0 }
 0x3cd   : > { %v1891_v48 = vmul.f32 %v1827_v16, %v1677_v36  ;;  %v1768_v21 = vsub.f32 %v3899_v60, %v4168_v15  ;;  %v1987_v9 = vpack.c.bf16 %v1947_v11, %v4258_v25  ;;  %v1989_v42 = vpack.c.bf16 %v1949_v13, %v4260_v47 }
 0x3ce   : > { %v1893_v22 = vmul.f32 %v1829_v53, %v1679_v7  ;;  %v1682_v4 = vmax.f32 %v1618_v49, 0.0  ;;  %v1617_v28 = vsub.f32 %v4176_v17, %v3902_v61  ;;  %v1767_v45 = vsub.f32 %v3905_v62, %v4176_v17 }
 0x3cf   : > { %v1894_v12 = vmul.f32 %v1830_v31, %v1680_v26  ;;  %v1832_v23 = vmax.f32 %v1768_v21, 0.0  ;;  %2333 = vmatprep.mubr.bf16.mxu0 %v1987_v9  ;;  %2430 = vmatprep.mubr.bf16.mxu1 %v1989_v42  ;;  %v1619_v8 = vsub.f32 %v4178_v52, %v3907_v63  ;;  %v1769_v15 = vsub.f32 %v3909_v1, %v4178_v52 }
 0x3d0   : > { %v1956_v25 = vmul.f32 %v1892_v30, %v1892_v30  ;;  %v1681_v47 = vmax.f32 %v1617_v28, 0.0  ;;  %v1831_v11 = vmax.f32 %v1767_v45, 0.0  ;;  %v1986_v41 = vpack.c.bf16 %v4262_v39, %v4238_v18  ;;  %v4477_v39 = vld [vmem:[#allocation19_spill] sm:$0xff] }
 0x3d1   : > { %v1955_v13 = vmul.f32 %v1891_v48, %v1891_v48  ;;  %v1683_v32 = vmax.f32 %v1619_v8, 0.0  ;;  %v1833_v14 = vmax.f32 %v1769_v15, 0.0  ;;  %v1988_v17 = vpack.c.bf16 %v4276_v5, %v4252_v20  ;;  %v4345_v48 = vld [vmem:[%s4479_s24] ss:$0 sm:$0xff] }
 0x3d2   : > { %v1957_v24 = vmul.f32 %v1893_v22, %v1893_v22  ;;  %2334 = vmatmul.mubr.bf16.gmra.mrb[84].mxu0 %v1986_v41  ;;  %v1620_v19 = vsub.f32 %v4188_v56, %v3892_v57  ;;  %v1770_v52 = vsub.f32 %v3895_v58, %v4188_v56  ;;  %v1622_v29 = vsub.f32 %v4190_v10, %v3897_v59  ;;  %v4478_v56 = vld [vmem:[#allocation20_spill] sm:$0xff] }
 0x3d3   : > { %v1958_v37 = vmul.f32 %v1894_v12, %v1894_v12  ;;  %v1896_v43 = vmul.f32 %v1832_v23, %v1682_v4  ;;  %2431 = vmatmul.mubr.bf16.gmra.mrb[84].mxu1 %v1988_v17  ;;  %v1772_v18 = vsub.f32 %v3899_v60, %v4190_v10  ;;  %v1621_v20 = vsub.f32 %v4477_v39, %v3902_v61 }
 0x3d4   : > { %v1895_v5 = vmul.f32 %v1831_v11, %v1681_v47  ;;  %v1684_v2 = vmax.f32 %v1620_v19, 0.0  ;;  %v1834_v27 = vmax.f32 %v1770_v52, 0.0  ;;  %v1686_v34 = vmax.f32 %v1622_v29, 0.0 }
 0x3d5   : > { %v1897_v57 = vmul.f32 %v1833_v14, %v1683_v32  ;;  %v1836_v38 = vmax.f32 %v1772_v18, 0.0  ;;  %v1685_v33 = vmax.f32 %v1621_v20, 0.0  ;;  %v1771_v58 = vsub.f32 %v3905_v62, %v4477_v39 }
 0x3d6   : > { %v1898_v59 = vmul.f32 %v1834_v27, %v1684_v2  ;;  %v1623_v36 = vsub.f32 %v4478_v56, %v3907_v63  ;;  %v1773_v60 = vsub.f32 %v3909_v1, %v4478_v56  ;;  %v1991_v10 = vpack.c.bf16 %v1955_v13, %v1951_v50 }
 0x3d7   : > { %v1900_v35 = vmul.f32 %v1836_v38, %v1686_v34  ;;  %v1835_v61 = vmax.f32 %v1771_v58, 0.0  ;;  %v1993_v51 = vpack.c.bf16 %v1957_v24, %v1953_v54  ;;  %v1990_v46 = vpack.c.bf16 %v1954_v3, %v4288_v40 }
 0x3d8   : > { %v1962_v0 = vmul.f32 %v1898_v59, %v1898_v59  ;;  %v1687_v44 = vmax.f32 %v1623_v36, 0.0  ;;  %v1837_v16 = vmax.f32 %v1773_v60, 0.0  ;;  %2341 = vmatprep.mubr.bf16.mxu0 %v1991_v10  ;;  %v1992_v6 = vpack.c.bf16 %v1956_v25, %v4302_v55 }
 0x3d9   : > { %v1960_v62 = vmul.f32 %v1896_v43, %v1896_v43  ;;  %v1964_v49 = vmul.f32 %v1900_v35, %v1900_v35  ;;  %v1899_v7 = vmul.f32 %v1835_v61, %v1685_v33  ;;  %2438 = vmatprep.mubr.bf16.mxu1 %v1993_v51  ;;  %v1959_v1 = vmul.f32 %v1895_v5, %v1895_v5 }
 0x3da   : > { %v1901_v63 = vmul.f32 %v1837_v16, %v1687_v44  ;;  %2342 = vmatmul.mubr.bf16.gmra.mrb[88].mxu0 %v1990_v46  ;;  %v1994_v53 = vpack.c.bf16 %v1962_v0, %v1958_v37  ;;  %v1961_v54 = vmul.f32 %v1897_v57, %v1897_v57 }
 0x3db   : > { %v1963_v50 = vmul.f32 %v1899_v7, %v1899_v7  ;;  %2439 = vmatmul.mubr.bf16.gmra.mrb[88].mxu1 %v1992_v6  ;;  %v1996_v26 = vpack.c.bf16 %v1964_v49, %v1960_v62 }
 0x3dc   : > { %v1965_v30 = vmul.f32 %v1901_v63, %v1901_v63 }
 0x3dd   : > { %v1995_v40 = vpack.c.bf16 %v1963_v50, %v1959_v1 }
 0x3de   : > { %v1997_v3 = vpack.c.bf16 %v1965_v30, %v1961_v54 }
 0x3df   : > { %2349 = vmatprep.mubr.bf16.mxu0 %v1995_v40 }
 0x3e0   : > { %2446 = vmatprep.mubr.bf16.mxu1 %v1997_v3 }
 0x3e2   : > { %2350 = vmatmul.mubr.bf16.gmra.mrb[92].mxu0 %v1994_v53 }
 0x3e3   : > { %2447 = vmatmul.mubr.bf16.gmra.mrb[92].mxu1 %v1996_v26 }
 0x462   : > { %v2762_v55 = vpop.f32.mrb[64].mxu0  ;;  %v2826_v31 = vpop.f32.mrb[64].mxu1 }
 0x463   : > { %v2763_v21 = vpop.f32.mrb[65].mxu0  ;;  %v2827_v9 = vpop.f32.mrb[65].mxu1 }
 0x464   : > { %v2764_v42 = vadd.f32 %v2763_v21, %v2762_v55  ;;  %v2828_v22 = vadd.f32 %v2827_v9, %v2826_v31  ;;  %v2765_v4 = vpop.f32.mrb[66].mxu0  ;;  %v2829_v28 = vpop.f32.mrb[66].mxu1 }
 0x465   : > { %v2766_v45 = vpop.f32.mrb[67].mxu0  ;;  %v2830_v12 = vpop.f32.mrb[67].mxu1 }
 0x466   : > { %v2296_v23 = vadd.f32 %v2764_v42, %v4345_v48  ;;  %v2767_v8 = vadd.f32 %v2766_v45, %v2765_v4  ;;  %v2831_v15 = vadd.f32 %v2830_v12, %v2829_v28 }
 0x468   : > { %v2393_v25 = vadd.f32 %v2828_v22, %v2296_v23  ;;  %v2299_v47 = vadd.f32 %v2767_v8, %v4345_v48 }
 0x46a   : > { %2455 = vst [vmem:[%s4351_s21] sm:$0xff] %v2393_v25  ;;  %v2396_v11 = vadd.f32 %v2831_v15, %v2299_v47 }
 0x46c   : > { %2456 = vst [vmem:[%s4351_s21 + $0x8] sm:$0xff] %v2396_v11 }
 0x471   : > { %v2768_v41 = vpop.f32.mrb[68].mxu0 }
 0x472   : > { %v2832_v13 = vpop.f32.mrb[68].mxu1  ;;  %v2769_v32 = vpop.f32.mrb[69].mxu0 }
 0x473   : > { %v2770_v14 = vadd.f32 %v2769_v32, %v2768_v41  ;;  %v2833_v17 = vpop.f32.mrb[69].mxu1  ;;  %v2771_v24 = vpop.f32.mrb[70].mxu0 }
 0x474   : > { %v2834_v19 = vadd.f32 %v2833_v17, %v2832_v13  ;;  %v2835_v52 = vpop.f32.mrb[70].mxu1  ;;  %v2772_v29 = vpop.f32.mrb[71].mxu0 }
 0x475   : > { %v2304_v37 = vadd.f32 %v2770_v14, %v4345_v48  ;;  %v2773_v43 = vadd.f32 %v2772_v29, %v2771_v24  ;;  %v2836_v18 = vpop.f32.mrb[71].mxu1 }
 0x476   : > { %v2837_v39 = vadd.f32 %v2836_v18, %v2835_v52 }
 0x477   : > { %v2401_v20 = vadd.f32 %v2834_v19, %v2304_v37  ;;  %v2307_v5 = vadd.f32 %v2773_v43, %v4345_v48 }
 0x479   : > { %2457 = vst [vmem:[%s4351_s21 + $0x10] sm:$0xff] %v2401_v20  ;;  %v2404_v2 = vadd.f32 %v2837_v39, %v2307_v5 }
 0x47b   : > { %2458 = vst [vmem:[%s4351_s21 + $0x18] sm:$0xff] %v2404_v2 }
 0x47e   : > { %v2774_v27 = vpop.f32.mrb[72].mxu0 }
 0x47f   : > { %v2838_v34 = vpop.f32.mrb[72].mxu1  ;;  %v2775_v57 = vpop.f32.mrb[73].mxu0 }
 0x480   : > { %v2776_v38 = vadd.f32 %v2775_v57, %v2774_v27  ;;  %v2839_v33 = vpop.f32.mrb[73].mxu1  ;;  %v2777_v58 = vpop.f32.mrb[74].mxu0 }
 0x481   : > { %v2840_v59 = vadd.f32 %v2839_v33, %v2838_v34  ;;  %v2841_v56 = vpop.f32.mrb[74].mxu1  ;;  %v2778_v36 = vpop.f32.mrb[75].mxu0 }
 0x482   : > { %v2312_v60 = vadd.f32 %v2776_v38, %v4345_v48  ;;  %v2779_v10 = vadd.f32 %v2778_v36, %v2777_v58  ;;  %v2842_v35 = vpop.f32.mrb[75].mxu1 }
 0x483   : > { %v2843_v61 = vadd.f32 %v2842_v35, %v2841_v56 }
 0x484   : > { %v2409_v51 = vadd.f32 %v2840_v59, %v2312_v60  ;;  %v2315_v46 = vadd.f32 %v2779_v10, %v4345_v48 }
 0x486   : > { %2459 = vst [vmem:[%s4351_s21 + $0x20] sm:$0xff] %v2409_v51  ;;  %v2412_v0 = vadd.f32 %v2843_v61, %v2315_v46 }
 0x488   : > { %2460 = vst [vmem:[%s4351_s21 + $0x28] sm:$0xff] %v2412_v0 }
 0x48b   : > { %v2780_v44 = vpop.f32.mrb[76].mxu0 }
 0x48c   : > { %v2844_v16 = vpop.f32.mrb[76].mxu1  ;;  %v2781_v6 = vpop.f32.mrb[77].mxu0 }
 0x48d   : > { %v2782_v62 = vadd.f32 %v2781_v6, %v2780_v44  ;;  %v2845_v49 = vpop.f32.mrb[77].mxu1  ;;  %v2783_v7 = vpop.f32.mrb[78].mxu0 }
 0x48e   : > { %v2846_v63 = vadd.f32 %v2845_v49, %v2844_v16  ;;  %v2847_v53 = vpop.f32.mrb[78].mxu1  ;;  %v2784_v1 = vpop.f32.mrb[79].mxu0 }
 0x48f   : > { %v2320_v50 = vadd.f32 %v2782_v62, %v4345_v48  ;;  %v2785_v26 = vadd.f32 %v2784_v1, %v2783_v7  ;;  %v2848_v54 = vpop.f32.mrb[79].mxu1 }
 0x490   : > { %v2849_v30 = vadd.f32 %v2848_v54, %v2847_v53 }
 0x491   : > { %v2417_v40 = vadd.f32 %v2846_v63, %v2320_v50  ;;  %v2323_v3 = vadd.f32 %v2785_v26, %v4345_v48 }
 0x493   : > { %2461 = vst [vmem:[%s4351_s21 + $0x30] sm:$0xff] %v2417_v40  ;;  %v2420_v55 = vadd.f32 %v2849_v30, %v2323_v3 }
 0x495   : > { %2462 = vst [vmem:[%s4351_s21 + $0x38] sm:$0xff] %v2420_v55 }
 0x498   : > { %v2786_v31 = vpop.f32.mrb[80].mxu0 }
 0x499   : > { %v2850_v21 = vpop.f32.mrb[80].mxu1  ;;  %v2787_v9 = vpop.f32.mrb[81].mxu0 }
 0x49a   : > { %v2788_v42 = vadd.f32 %v2787_v9, %v2786_v31  ;;  %v2851_v22 = vpop.f32.mrb[81].mxu1  ;;  %v2789_v4 = vpop.f32.mrb[82].mxu0 }
 0x49b   : > { %v2852_v28 = vadd.f32 %v2851_v22, %v2850_v21  ;;  %v2853_v45 = vpop.f32.mrb[82].mxu1  ;;  %v2790_v12 = vpop.f32.mrb[83].mxu0 }
 0x49c   : > { %v2328_v23 = vadd.f32 %v2788_v42, %v4345_v48  ;;  %v2791_v8 = vadd.f32 %v2790_v12, %v2789_v4  ;;  %v2854_v15 = vpop.f32.mrb[83].mxu1 }
 0x49d   : > { %v2855_v25 = vadd.f32 %v2854_v15, %v2853_v45 }
 0x49e   : > { %v2425_v47 = vadd.f32 %v2852_v28, %v2328_v23  ;;  %v2331_v11 = vadd.f32 %v2791_v8, %v4345_v48 }
 0x4a0   : > { %2463 = vst [vmem:[%s4351_s21 + $0x40] sm:$0xff] %v2425_v47  ;;  %v2428_v41 = vadd.f32 %v2855_v25, %v2331_v11 }
 0x4a2   : > { %2464 = vst [vmem:[%s4351_s21 + $0x48] sm:$0xff] %v2428_v41 }
 0x4a5   : > { %v2792_v13 = vpop.f32.mrb[84].mxu0 }
 0x4a6   : > { %v2856_v32 = vpop.f32.mrb[84].mxu1  ;;  %v2793_v14 = vpop.f32.mrb[85].mxu0 }
 0x4a7   : > { %v2794_v17 = vadd.f32 %v2793_v14, %v2792_v13  ;;  %v2857_v24 = vpop.f32.mrb[85].mxu1  ;;  %v2795_v19 = vpop.f32.mrb[86].mxu0 }
 0x4a8   : > { %v2858_v52 = vadd.f32 %v2857_v24, %v2856_v32  ;;  %v2859_v29 = vpop.f32.mrb[86].mxu1  ;;  %v2796_v37 = vpop.f32.mrb[87].mxu0 }
 0x4a9   : > { %v2336_v43 = vadd.f32 %v2794_v17, %v4345_v48  ;;  %v2797_v18 = vadd.f32 %v2796_v37, %v2795_v19  ;;  %v2860_v39 = vpop.f32.mrb[87].mxu1 }
 0x4aa   : > { %v2861_v20 = vadd.f32 %v2860_v39, %v2859_v29 }
 0x4ab   : > { %v2433_v5 = vadd.f32 %v2858_v52, %v2336_v43  ;;  %v2339_v2 = vadd.f32 %v2797_v18, %v4345_v48 }
 0x4ad   : > { %2465 = vst [vmem:[%s4351_s21 + $0x50] sm:$0xff] %v2433_v5  ;;  %v2436_v27 = vadd.f32 %v2861_v20, %v2339_v2  ;;  %v2798_v34 = vpop.f32.mrb[88].mxu0 }
 0x4ae   : > { %v2862_v57 = vpop.f32.mrb[88].mxu1  ;;  %v2799_v38 = vpop.f32.mrb[89].mxu0 }
 0x4af   : > { %2466 = vst [vmem:[%s4351_s21 + $0x58] sm:$0xff] %v2436_v27  ;;  %v2800_v33 = vadd.f32 %v2799_v38, %v2798_v34  ;;  %v2863_v58 = vpop.f32.mrb[89].mxu1  ;;  %v2801_v59 = vpop.f32.mrb[90].mxu0 }
 0x4b0   : > { %v2864_v56 = vadd.f32 %v2863_v58, %v2862_v57  ;;  %v2865_v36 = vpop.f32.mrb[90].mxu1  ;;  %v2802_v60 = vpop.f32.mrb[91].mxu0 }
 0x4b1   : > { %v2344_v10 = vadd.f32 %v2800_v33, %v4345_v48  ;;  %v2803_v35 = vadd.f32 %v2802_v60, %v2801_v59  ;;  %v2866_v61 = vpop.f32.mrb[91].mxu1 }
 0x4b2   : > { %v2867_v51 = vadd.f32 %v2866_v61, %v2865_v36 }
 0x4b3   : > { %v2441_v46 = vadd.f32 %v2864_v56, %v2344_v10  ;;  %v2347_v0 = vadd.f32 %v2803_v35, %v4345_v48 }
 0x4b5   : > { %2467 = vst [vmem:[%s4351_s21 + $0x60] sm:$0xff] %v2441_v46  ;;  %v2444_v44 = vadd.f32 %v2867_v51, %v2347_v0  ;;  %v2804_v16 = vpop.f32.mrb[92].mxu0 }
 0x4b6   : > { %v2868_v6 = vpop.f32.mrb[92].mxu1  ;;  %v2805_v62 = vpop.f32.mrb[93].mxu0 }
 0x4b7   : > { %2468 = vst [vmem:[%s4351_s21 + $0x68] sm:$0xff] %v2444_v44  ;;  %v2806_v49 = vadd.f32 %v2805_v62, %v2804_v16  ;;  %v2869_v7 = vpop.f32.mrb[93].mxu1  ;;  %v2807_v63 = vpop.f32.mrb[94].mxu0 }
 0x4b8   : > { %v2870_v53 = vadd.f32 %v2869_v7, %v2868_v6  ;;  %v2871_v1 = vpop.f32.mrb[94].mxu1  ;;  %v2808_v50 = vpop.f32.mrb[95].mxu0 }
 0x4b9   : > { %v2352_v26 = vadd.f32 %v2806_v49, %v4345_v48  ;;  %v2809_v54 = vadd.f32 %v2808_v50, %v2807_v63  ;;  %v2872_v30 = vpop.f32.mrb[95].mxu1 }
 0x4ba   : > { %v2873_v40 = vadd.f32 %v2872_v30, %v2871_v1 }
 0x4bb   : > { %v2449_v3 = vadd.f32 %v2870_v53, %v2352_v26  ;;  %v2355_v55 = vadd.f32 %v2809_v54, %v4345_v48 }
 0x4bd   : > { %2469 = vst [vmem:[%s4351_s21 + $0x70] sm:$0xff] %v2449_v3  ;;  %v2452_v31 = vadd.f32 %v2873_v40, %v2355_v55 }
 0x4bf   : > { %2470 = vst [vmem:[%s4351_s21 + $0x78] sm:$0xff] %v2452_v31 }
 0x4c0   : > { %3309 = shalt.err (!%p3306_p8)
}
 0x4c1   : > { %s3310_s24 = scalar_lea.hbm %s4386_s26, 2048  ;;  %s3314_s8 = scalar_lea.hbm %s4480_s30, 4096 }
 0x4c2   : > { %p3311_p6 = scmp.ne.s32.totalorder %s4386_s26, %s3310_s24  ;;  %p3315_p1 = scmp.lt.u32.totalorder %s4386_s26, %s4480_s30 }
 0x4c3   : > { %p3316_p0 = scmp.lt.u32.totalorder %s3314_s8, %s3310_s24  ;;  %p3318_p2 = scmp.lt.u32.totalorder %s3310_s24, %s4386_s26 }
 0x4c4   : > { %p3312_p9 = pnand %p3311_p6, %p4481_p7 }
 0x4c5   : > { %p3317_p5 = por %p3316_p0, %p3315_p1 }
 0x4c6   : > { %p3313_p4 = pneg %p3312_p9 }
 0x4c7   : > { %p3319_p10 = por %p3318_p2, %p3317_p5 }
 0x4c9   : > { %p3320_p11 = pnand %p3319_p10, %p3313_p4 }
 0x4cb   : > { %3323 = shalt.err (!%p3320_p11)
}
 0x4cc   : > { %s3392_s23 = smov 128   ;;  %s3393_s22 = smov 8  }
 0x4cd   : > { %2992 = dma.vmem_to_hbm [thread:$0]  (%p4481_p7), %s4388_s11, 2048, %s4386_s26, %s2472_s13, %s3392_s23, %s3392_s23, %s3393_s22  }
 0x4ce PF: > { %s2500_s29 = sand.u32 1, %s3362_s17   ;;  %p4482_p3 = scmp.ne.s32.totalorder %s4465_s28, 0 }
 0x4cf   : > { %p4483_p12 = scmp.ge.s32.totalorder %s3374_s20, 2  ;;  %s2501_s24 = scalar_lea.sflag [#allocation4], %s2500_s29 }
 0x4d1   : > { %p3015_p13 = pnand %p4483_p12, %p4482_p3 }
 0x4d3   : > { %3357 = dma.done.wait (!%p3015_p13), %s2501_s24, 2048  }
 0x4d4   : > { %3359 = vsyncadd (!%p3015_p13), %s2501_s24, 4294965248  ;;  %p27_p8 = scmp.ge.s32.totalorder %s3614_s16, 4   ;;  %s4484_s17 = smov %s3366_s18 }
 0x4d5   : > { %s4485_s18 = smov %s3370_s19  ;;  %s4486_s19 = smov %s3626_s14 }
 0x4d6   : > { %s4487_s20 = smov %s3614_s16  ;;  %29 = sbr.rel (!%p27_p8) target bundleno = 12 (0xc), region = 129 }
 0x4dd   :  { %2506 = vsyncpa [#allocation3], 1 }
 0x4de   :  { %2508 = vsyncpa [#allocation3 + $0x1], 1 }
 0x4df   :  { %2509 = vsyncpa [#allocation6], 1 }
 0x4e0   :  { %2510 = vsyncpa [#allocation9], 1 }
 0x4e1   :  { %2511 = vsyncpa [#allocation12], 1 }
 0x4e2   :  { %2512 = vsyncpa [#allocation4], 1 }
 0x4e3   :  { %2514 = vsyncpa [#allocation4 + $0x1], 1 }

</bundles_post_ra>
